<compile_context>
chip_gen: v7x
topology: tpu7x:2x2x1
jax: 0.10.0
libtpu: 0.0.40
codegen_flags: <defaults>
</compile_context>

<pallas_src>
import functools

import jax
import jax.numpy as jnp
from jax import lax
from jax.experimental import pallas as pl
from jax.experimental.pallas import tpu as pltpu


# ----------------------------------------------------------------------------
# 1-D bilinear resize matrix matching F.interpolate(mode='bilinear',
# align_corners=False) semantics.
# ----------------------------------------------------------------------------
def bilinear_resize_matrix(in_size, out_size):
    scale = in_size / out_size
    dst = jnp.arange(out_size, dtype=jnp.float32)
    src = (dst + 0.5) * scale - 0.5
    src = jnp.maximum(src, 0.0)                      # PyTorch clamps negative src to 0
    i0 = jnp.clip(jnp.floor(src).astype(jnp.int32), 0, in_size - 1)
    i1 = jnp.minimum(i0 + 1, in_size - 1)
    w1 = src - i0.astype(jnp.float32)
    w0 = 1.0 - w1
    rows = jnp.arange(out_size)
    a = jnp.zeros((out_size, in_size), jnp.float32)
    a = a.at[rows, i0].add(w0)
    a = a.at[rows, i1].add(w1)
    return a


def _newton_recip(x):
    # EUP approximate reciprocal + one Newton-Raphson step (~2^-24 relative):
    # rides the otherwise-idle EUP slot instead of a serial exact-divide chain.
    y = pl.reciprocal(x, approx=True)
    return y * (2.0 - x * y)


# ----------------------------------------------------------------------------
# Fused Pallas kernel: per-memory cosine-sim attention, label projection,
# bilinear upsample, mean/unbiased-std over memories, and the masked
# closed-form gradient-descent merge — all in one grid=(1,) invocation.
# ----------------------------------------------------------------------------
def _attention_gd_fused_kernel(te_ref, tr_ref, lab_ref, ts_ref, umat_hbm,
                               out_ref, pd_ref, umat_vmem, umat_sem, *,
                               nmem, temp, niter, gamma, std_clamp):
    # HIGHEST (f32-equivalent) for everything feeding the binary threshold
    # mask: the x50 temperature + hard threshold make bf16x3 rounding visible.
    prec = lax.Precision.HIGHEST

    # Single-buffered upsample matrix: start its DMA now, wait right before the
    # upsample matmul so it overlaps the whole sim/softmax loop (no BlockSpec
    # double-buffering, no pipeline benefit to lose at grid=(1,)).
    umat_cp = pltpu.make_async_copy(umat_hbm, umat_vmem, umat_sem)
    umat_cp.start()

    # --- test features: channels on sublanes, normalized once ----------------
    te = te_ref[...]                                           # (c, Ni)
    te_n = te * lax.rsqrt(jnp.sum(te * te, axis=0, keepdims=True))

    lab = lab_ref[...]                                         # (nmem, Nj)

    # --- per-memory attention (static unroll; nmem is the small memory size) -
    for m in range(nmem):
        tr = tr_ref[m]                                         # (c, Nj)
        tr_n = tr * lax.rsqrt(jnp.sum(tr * tr, axis=0, keepdims=True))

        # sim^T (Nj, Ni): contract the leading channel (sublane) axis, trans-A
        # form — no replicated/broadcast LHS, pixels stay lane-dense.
        s = lax.dot_general(tr_n, te_n, (((0,), (0,)), ((), ())),
                            precision=prec,
                            preferred_element_type=jnp.float32)  # (Nj, Ni)

        # Softmax over train pixels (axis 0).  The per-column max is kept
        # deliberately: the constant-shift variant temp*(sim-1) underflows the
        # whole denominator when every sim in a column is < ~-0.75.
        logits = temp * s
        logits = logits - jnp.max(logits, axis=0, keepdims=True)
        e = jnp.exp(logits)
        denom = jnp.sum(e, axis=0, keepdims=True)              # (1, Ni)
        p = e * _newton_recip(denom)                           # (Nj, Ni)

        # Label projection on the MXU (replaces VPU multiply + XLU lane reduce):
        # (1, Nj) @ (Nj, Ni) -> one lane-dense row of pmt_down.
        pd_ref[m:m + 1, :] = jnp.dot(lab[m:m + 1, :], p,
                                     precision=prec,
                                     preferred_element_type=jnp.float32)

    # --- bilinear upsample back to label resolution (one batched matmul) -----
    umat_cp.wait()
    pmt = jnp.dot(pd_ref[...], umat_vmem[...],
                  precision=prec,
                  preferred_element_type=jnp.float32)          # (nmem, L)

    # --- mean / unbiased std over memory frames (two-pass, no cancellation) --
    mean = jnp.sum(pmt, axis=0, keepdims=True) * (1.0 / nmem)  # (1, L)
    diff = pmt - mean
    var = jnp.sum(diff * diff, axis=0, keepdims=True) * (1.0 / (nmem - 1))
    std = jnp.sqrt(var)

    # --- masked gradient-descent merge, in closed form ------------------------
    ts = ts_ref[...]                                           # (1, L)
    L = ts.shape[-1]

    mean_max = jnp.max(mean, keepdims=True)                    # (1, 1)
    ts_max = jnp.max(ts, keepdims=True)
    # mirrors PyTorch: no guard against test_scores.max() <= 0
    scale = mean_max / ts_max
    inv_scale = ts_max / mean_max

    mean_mean = jnp.sum(mean, keepdims=True) * (1.0 / L)
    ts_mean = jnp.sum(ts, keepdims=True) * (1.0 / L)
    mask = (mean > mean_mean) & (ts > ts_mean)

    sig = jnp.maximum(std, std_clamp)
    r = gamma * _newton_recip(sig * sig)                       # gamma / sig^2
    a = 1.0 - r
    # x_{k+1} = x_k - r (x_k - mu)   ==>   x_N = mu + a^N (x_0 - mu)
    # a^niter via trace-time exponentiation-by-squaring (niter is static).
    a_pow = jnp.ones_like(a)
    base = a
    n = niter
    while n:
        if n & 1:
            a_pow = a_pow * base
        base = base * base
        n >>= 1

    x0 = scale * ts
    x_fin = mean + a_pow * (x0 - mean)
    out_ref[...] = jnp.where(mask, x_fin * inv_scale, ts)


# ----------------------------------------------------------------------------
# Wrapper
# ----------------------------------------------------------------------------
def attention_gd_merge(test_scores, train_labels, test_feat, train_feats,
                       softmax_temp=50.0, niter=150, gamma=1e-4,
                       std_clamp=0.05):
    te_nf, nseq, c, wf, hf = test_feat.shape
    nmem = train_feats.shape[0]
    _, _, wl, hl = test_scores.shape
    assert te_nf == 1, "module semantics require a single test frame"
    assert nseq == 1, "final torch reshape requires nseq == 1"
    assert nmem >= 2, "std over memory frames needs nmem >= 2"

    N = wf * hf
    L = wl * hl

    a_dh = bilinear_resize_matrix(wl, wf)   # (wf, wl)
    a_dw = bilinear_resize_matrix(hl, hf)   # (hf, hl)
    a_uh = bilinear_resize_matrix(wf, wl)   # (wl, wf)
    a_uw = bilinear_resize_matrix(hf, hl)   # (hl, hf)

    # Label downsample = cheap separable preprocessing in the wrapper.
    lab2d = train_labels[:, 0].astype(jnp.float32)             # (nmem, wl, hl)
    lab_down = jnp.einsum('ar,mrs,bs->mab', a_dh, lab2d, a_dw,
                          precision=lax.Precision.HIGHEST).reshape(nmem, N)

    # Dense upsample matrix (N, L), kept so the whole mean/std/mask/GD epilogue
    # stays fused in-kernel on the flat lane-major layout; single-buffered via
    # pl.ANY + one manual DMA inside the kernel.
    umat = jnp.kron(a_uh, a_uw).T                              # (N, L)

    # Channel-on-sublanes layout: the natural (.., c, wf, hf) memory order
    # collapses to (c, N) / (nmem, c, N) with pure reshapes — no transposes.
    test_feat_cn = test_feat.reshape(c, N).astype(jnp.float32)          # (c, N)
    train_feats_cn = train_feats.reshape(nmem, c, N).astype(jnp.float32)  # (nmem, c, N)
    test_scores_flat = test_scores.reshape(1, L).astype(jnp.float32)    # (1, L)

    kernel = functools.partial(
        _attention_gd_fused_kernel, nmem=nmem, temp=float(softmax_temp),
        niter=int(niter), gamma=float(gamma), std_clamp=float(std_clamp))

    out = pl.pallas_call(
        kernel,
        out_shape=jax.ShapeDtypeStruct((1, L), jnp.float32),
        grid_spec=pltpu.PrefetchScalarGridSpec(
            num_scalar_prefetch=0,
            grid=(1,),
            in_specs=[
                pl.BlockSpec((c, N), lambda i: (0, 0)),            # test feat (c, N)
                pl.BlockSpec((nmem, c, N), lambda i: (0, 0, 0)),   # train feats
                pl.BlockSpec((nmem, N), lambda i: (0, 0)),         # downsampled labels
                pl.BlockSpec((1, L), lambda i: (0, 0)),            # test scores
                pl.BlockSpec(memory_space=pl.ANY),                 # umat: raw ref, manual DMA
            ],
            out_specs=pl.BlockSpec((1, L), lambda i: (0, 0)),
            scratch_shapes=[
                pltpu.VMEM((nmem, N), jnp.float32),   # pmt_down staging rows
                pltpu.VMEM((N, L), jnp.float32),      # upsample matrix (single buffer)
                pltpu.SemaphoreType.DMA(()),          # its DMA completion sem
            ],
        ),
        input_output_aliases={3: 0},    # test_scores buffer reused for output
        compiler_params=pltpu.CompilerParams(
            dimension_semantics=("arbitrary",),
            # Explicit scoped-VMEM headroom (v5e default is only 16 MiB);
            # re-derive per generation / per resolution at production sizes.
            vmem_limit_bytes=64 * 1024 * 1024),
    )(test_feat_cn, train_feats_cn, lab_down, test_scores_flat, umat)

    return out.reshape(1, nseq, wl, hl)


# ----------------------------------------------------------------------------
# Pure-JAX reference mirroring the PyTorch forward (incl. the explicit
# 150-iteration gradient descent) for correctness checking.
# ----------------------------------------------------------------------------
def reference(test_scores, train_labels, test_feat, train_feats, temp=50.0):
    te_nf, nseq, c, wf, hf = test_feat.shape
    nmem = train_feats.shape[0]
    _, _, wl, hl = test_scores.shape

    tr = jnp.transpose(train_feats, (1, 2, 0, 3, 4)).reshape(nseq, c, nmem * wf * hf)
    te = jnp.transpose(test_feat, (1, 2, 0, 3, 4)).reshape(nseq, c, te_nf * wf * hf)
    trn = tr / jnp.sqrt(jnp.sum(tr * tr, axis=1, keepdims=True))
    ten = te / jnp.sqrt(jnp.sum(te * te, axis=1, keepdims=True))
    sim = jnp.einsum('bij,bik->bjk', ten, trn, precision='highest')
    sim = sim.reshape(nseq, wf * hf, nmem, wf * hf).transpose(2, 0, 1, 3)

    a_dh = bilinear_resize_matrix(wl, wf)
    a_dw = bilinear_resize_matrix(hl, hf)
    lab_down = jnp.einsum('ar,mnrc,bc->mnab', a_dh, train_labels, a_dw,
                          precision='highest')
    p = jax.nn.softmax(temp * sim, axis=3)
    z = jnp.einsum('mnij,mnj->mni', p, lab_down.reshape(nmem, nseq, wf * hf),
                   precision='highest')
    pmt_down = z.reshape(nmem, nseq, wf, hf)

    a_uh = bilinear_resize_matrix(wf, wl)
    a_uw = bilinear_resize_matrix(hf, hl)
    pmt = jnp.einsum('xa,mnab,yb->mnxy', a_uh, pmt_down, a_uw, precision='highest')

    mean = jnp.mean(pmt, axis=0)
    std = jnp.std(pmt, axis=0, ddof=1)
    scale = jnp.max(mean) / jnp.max(test_scores)
    mask = (mean[0] > jnp.mean(mean)) & (test_scores[0, 0] > jnp.mean(test_scores))
    sig = jnp.maximum(std[0], 0.05)
    x = scale * test_scores[0, 0]
    for _ in range(150):
        x = x - 1e-4 * (x - mean[0]) / (sig * sig)
    new = jnp.where(mask, x / scale, test_scores[0, 0])
    return new.reshape(1, nseq, wl, hl)


if __name__ == "__main__":
    key = jax.random.PRNGKey(0)
    k1, k2, k3, k4 = jax.random.split(key, 4)

    nmem, nseq, c, wf, hf = 3, 1, 8, 8, 8
    wl, hl = 16, 16
    softmax_temp_init = 50.0     # deterministic init of nn.Parameter(50.0 * ones(1))

    test_scores = jax.random.normal(k1, (1, nseq, wl, hl), jnp.float32)
    train_labels = jax.random.uniform(k2, (nmem, nseq, wl, hl), jnp.float32)
    test_feat = jax.random.normal(k3, (1, nseq, c, wf, hf), jnp.float32)
    train_feats = jax.random.normal(k4, (nmem, nseq, c, wf, hf), jnp.float32)

    out = attention_gd_merge(test_scores, train_labels, test_feat, train_feats,
                             softmax_temp=softmax_temp_init)
    out = jax.block_until_ready(out)

    ref = jax.block_until_ready(
        reference(test_scores, train_labels, test_feat, train_feats,
                  temp=softmax_temp_init))

    assert out.shape == (1, nseq, wl, hl)
    assert bool(jnp.all(jnp.isfinite(out)))
    assert bool(jnp.allclose(out, ref, atol=5e-3, rtol=5e-3)), (
        f"max abs diff {float(jnp.max(jnp.abs(out - ref)))}")

    print("KERNEL_OK")
</pallas_src>

<mosaic_0001>
module attributes {stable_mosaic.version = 11 : i64} {
  func.func @_attention_gd_fused_kernel(%arg0: i32, %arg1: memref<8x64xf32, #tpu.memory_space<vmem>>, %arg2: memref<3x8x64xf32, #tpu.memory_space<vmem>>, %arg3: memref<3x64xf32, #tpu.memory_space<vmem>>, %arg4: memref<1x256xf32, #tpu.memory_space<vmem>>, %arg5: memref<64x256xf32, #tpu.memory_space<any>>, %arg6: memref<1x256xf32, #tpu.memory_space<vmem>>, %arg7: memref<3x64xf32, #tpu.memory_space<vmem>>, %arg8: memref<64x256xf32, #tpu.memory_space<vmem>>, %arg9: memref<!tpu.dma_semaphore, #tpu.memory_space<semaphore_mem>>) attributes {dimension_semantics = [#tpu.dimension_semantics<arbitrary>], iteration_bounds = array<i64: 1>, scalar_prefetch = 0 : i64, scratch_operands = 3 : i64, tpu.core_type = #tpu.core_type<tc>, window_params = [{pipeline_mode = #tpu.pipeline_mode<synchronous>, transform_indices = @transform_0, window_bounds = array<i64: 8, 64>}, {pipeline_mode = #tpu.pipeline_mode<synchronous>, transform_indices = @transform_1, window_bounds = array<i64: 3, 8, 64>}, {pipeline_mode = #tpu.pipeline_mode<synchronous>, transform_indices = @transform_2, window_bounds = array<i64: 3, 64>}, {pipeline_mode = #tpu.pipeline_mode<synchronous>, transform_indices = @transform_3, window_bounds = array<i64: 1, 256>}, {}, {pipeline_mode = #tpu.pipeline_mode<synchronous>, transform_indices = @transform_5, window_bounds = array<i64: 1, 256>}]} {
    tpu.enqueue_dma source(%arg5 : memref<64x256xf32, #tpu.memory_space<any>>) target(%arg8 : memref<64x256xf32, #tpu.memory_space<vmem>>) target_semaphore(%arg9 : memref<!tpu.dma_semaphore, #tpu.memory_space<semaphore_mem>>)
    %c0 = arith.constant 0 : index
    %c0_0 = arith.constant 0 : index
    %0 = vector.load %arg1[%c0, %c0_0] : memref<8x64xf32, #tpu.memory_space<vmem>>, vector<8x64xf32>
    %1 = arith.mulf %0, %0 : vector<8x64xf32>
    %cst = arith.constant dense<0.000000e+00> : vector<64xf32>
    %2 = vector.multi_reduction <add>, %1, %cst [0] : vector<8x64xf32> to vector<64xf32>
    %3 = vector.shape_cast %2 : vector<64xf32> to vector<1x64xf32>
    %4 = math.rsqrt %3 : vector<1x64xf32>
    %5 = vector.broadcast %4 : vector<1x64xf32> to vector<8x64xf32>
    %6 = arith.mulf %0, %5 : vector<8x64xf32>
    %c0_1 = arith.constant 0 : index
    %c0_2 = arith.constant 0 : index
    %7 = vector.load %arg3[%c0_1, %c0_2] : memref<3x64xf32, #tpu.memory_space<vmem>>, vector<3x64xf32>
    %c0_3 = arith.constant 0 : index
    %c0_4 = arith.constant 0 : index
    %c0_5 = arith.constant 0 : index
    %8 = vector.load %arg2[%c0_3, %c0_4, %c0_5] : memref<3x8x64xf32, #tpu.memory_space<vmem>>, vector<1x8x64xf32>
    %9 = vector.shape_cast %8 : vector<1x8x64xf32> to vector<8x64xf32>
    %10 = arith.mulf %9, %9 : vector<8x64xf32>
    %cst_6 = arith.constant dense<0.000000e+00> : vector<64xf32>
    %11 = vector.multi_reduction <add>, %10, %cst_6 [0] : vector<8x64xf32> to vector<64xf32>
    %12 = vector.shape_cast %11 : vector<64xf32> to vector<1x64xf32>
    %13 = math.rsqrt %12 : vector<1x64xf32>
    %14 = vector.broadcast %13 : vector<1x64xf32> to vector<8x64xf32>
    %15 = arith.mulf %9, %14 : vector<8x64xf32>
    %cst_7 = arith.constant dense<0.000000e+00> : vector<64x64xf32>
    %16 = tpu.matmul %15, %6, %cst_7 {dimension_numbers = #tpu.dot_dimension_numbers<[0], [0], [1], [1], [0, 1, 1, 1], [], []>, precision = #tpu.contract_precision<fp32>} : vector<8x64xf32>, vector<8x64xf32>, vector<64x64xf32> -> vector<64x64xf32>
    %cst_8 = arith.constant 5.000000e+01 : f32
    %17 = vector.broadcast %cst_8 : f32 to vector<64x64xf32>
    %18 = arith.mulf %17, %16 : vector<64x64xf32>
    %cst_9 = arith.constant dense<0xFF800000> : vector<64xf32>
    %19 = vector.multi_reduction <maximumf>, %18, %cst_9 [0] : vector<64x64xf32> to vector<64xf32>
    %20 = vector.shape_cast %19 : vector<64xf32> to vector<1x64xf32>
    %21 = vector.broadcast %20 : vector<1x64xf32> to vector<64x64xf32>
    %22 = arith.subf %18, %21 : vector<64x64xf32>
    %23 = math.exp %22 : vector<64x64xf32>
    %cst_10 = arith.constant dense<0.000000e+00> : vector<64xf32>
    %24 = vector.multi_reduction <add>, %23, %cst_10 [0] : vector<64x64xf32> to vector<64xf32>
    %25 = vector.shape_cast %24 : vector<64xf32> to vector<1x64xf32>
    %26 = tpu.reciprocal %25 {approx = true} : vector<1x64xf32> -> vector<1x64xf32>
    %27 = arith.mulf %25, %26 : vector<1x64xf32>
    %cst_11 = arith.constant 2.000000e+00 : f32
    %28 = vector.broadcast %cst_11 : f32 to vector<1x64xf32>
    %29 = arith.subf %28, %27 : vector<1x64xf32>
    %30 = arith.mulf %26, %29 : vector<1x64xf32>
    %31 = vector.broadcast %30 : vector<1x64xf32> to vector<64x64xf32>
    %32 = arith.mulf %23, %31 : vector<64x64xf32>
    %33 = vector.extract_strided_slice %7 {offsets = [0, 0], sizes = [1, 64], strides = [1, 1]} : vector<3x64xf32> to vector<1x64xf32>
    %cst_12 = arith.constant dense<0.000000e+00> : vector<1x64xf32>
    %34 = tpu.matmul %33, %32, %cst_12 {dimension_numbers = #tpu.dot_dimension_numbers<[1], [0], [0], [1], [0, 0, 1, 1], [], []>, precision = #tpu.contract_precision<fp32>} : vector<1x64xf32>, vector<64x64xf32>, vector<1x64xf32> -> vector<1x64xf32>
    %c0_13 = arith.constant 0 : index
    %c0_14 = arith.constant 0 : index
    %35 = vector.load %arg7[%c0_13, %c0_14] : memref<3x64xf32, #tpu.memory_space<vmem>>, vector<1x64xf32>
    tpu.vector_store %arg7[%c0_13, %c0_14], %34 {strides = array<i32>} : memref<3x64xf32, #tpu.memory_space<vmem>>, vector<1x64xf32>,
    %c1 = arith.constant 1 : index
    %c0_15 = arith.constant 0 : index
    %c0_16 = arith.constant 0 : index
    %36 = vector.load %arg2[%c1, %c0_15, %c0_16] : memref<3x8x64xf32, #tpu.memory_space<vmem>>, vector<1x8x64xf32>
    %37 = vector.shape_cast %36 : vector<1x8x64xf32> to vector<8x64xf32>
    %38 = arith.mulf %37, %37 : vector<8x64xf32>
    %cst_17 = arith.constant dense<0.000000e+00> : vector<64xf32>
    %39 = vector.multi_reduction <add>, %38, %cst_17 [0] : vector<8x64xf32> to vector<64xf32>
    %40 = vector.shape_cast %39 : vector<64xf32> to vector<1x64xf32>
    %41 = math.rsqrt %40 : vector<1x64xf32>
    %42 = vector.broadcast %41 : vector<1x64xf32> to vector<8x64xf32>
    %43 = arith.mulf %37, %42 : vector<8x64xf32>
    %cst_18 = arith.constant dense<0.000000e+00> : vector<64x64xf32>
    %44 = tpu.matmul %43, %6, %cst_18 {dimension_numbers = #tpu.dot_dimension_numbers<[0], [0], [1], [1], [0, 1, 1, 1], [], []>, precision = #tpu.contract_precision<fp32>} : vector<8x64xf32>, vector<8x64xf32>, vector<64x64xf32> -> vector<64x64xf32>
    %cst_19 = arith.constant 5.000000e+01 : f32
    %45 = vector.broadcast %cst_19 : f32 to vector<64x64xf32>
    %46 = arith.mulf %45, %44 : vector<64x64xf32>
    %cst_20 = arith.constant dense<0xFF800000> : vector<64xf32>
    %47 = vector.multi_reduction <maximumf>, %46, %cst_20 [0] : vector<64x64xf32> to vector<64xf32>
    %48 = vector.shape_cast %47 : vector<64xf32> to vector<1x64xf32>
    %49 = vector.broadcast %48 : vector<1x64xf32> to vector<64x64xf32>
    %50 = arith.subf %46, %49 : vector<64x64xf32>
    %51 = math.exp %50 : vector<64x64xf32>
    %cst_21 = arith.constant dense<0.000000e+00> : vector<64xf32>
    %52 = vector.multi_reduction <add>, %51, %cst_21 [0] : vector<64x64xf32> to vector<64xf32>
    %53 = vector.shape_cast %52 : vector<64xf32> to vector<1x64xf32>
    %54 = tpu.reciprocal %53 {approx = true} : vector<1x64xf32> -> vector<1x64xf32>
    %55 = arith.mulf %53, %54 : vector<1x64xf32>
    %cst_22 = arith.constant 2.000000e+00 : f32
    %56 = vector.broadcast %cst_22 : f32 to vector<1x64xf32>
    %57 = arith.subf %56, %55 : vector<1x64xf32>
    %58 = arith.mulf %54, %57 : vector<1x64xf32>
    %59 = vector.broadcast %58 : vector<1x64xf32> to vector<64x64xf32>
    %60 = arith.mulf %51, %59 : vector<64x64xf32>
    %61 = vector.extract_strided_slice %7 {offsets = [1, 0], sizes = [1, 64], strides = [1, 1]} : vector<3x64xf32> to vector<1x64xf32>
    %cst_23 = arith.constant dense<0.000000e+00> : vector<1x64xf32>
    %62 = tpu.matmul %61, %60, %cst_23 {dimension_numbers = #tpu.dot_dimension_numbers<[1], [0], [0], [1], [0, 0, 1, 1], [], []>, precision = #tpu.contract_precision<fp32>} : vector<1x64xf32>, vector<64x64xf32>, vector<1x64xf32> -> vector<1x64xf32>
    %c1_24 = arith.constant 1 : index
    %c0_25 = arith.constant 0 : index
    %63 = vector.load %arg7[%c1_24, %c0_25] : memref<3x64xf32, #tpu.memory_space<vmem>>, vector<1x64xf32>
    tpu.vector_store %arg7[%c1_24, %c0_25], %62 {strides = array<i32>} : memref<3x64xf32, #tpu.memory_space<vmem>>, vector<1x64xf32>,
    %c2 = arith.constant 2 : index
    %c0_26 = arith.constant 0 : index
    %c0_27 = arith.constant 0 : index
    %64 = vector.load %arg2[%c2, %c0_26, %c0_27] : memref<3x8x64xf32, #tpu.memory_space<vmem>>, vector<1x8x64xf32>
    %65 = vector.shape_cast %64 : vector<1x8x64xf32> to vector<8x64xf32>
    %66 = arith.mulf %65, %65 : vector<8x64xf32>
    %cst_28 = arith.constant dense<0.000000e+00> : vector<64xf32>
    %67 = vector.multi_reduction <add>, %66, %cst_28 [0] : vector<8x64xf32> to vector<64xf32>
    %68 = vector.shape_cast %67 : vector<64xf32> to vector<1x64xf32>
    %69 = math.rsqrt %68 : vector<1x64xf32>
    %70 = vector.broadcast %69 : vector<1x64xf32> to vector<8x64xf32>
    %71 = arith.mulf %65, %70 : vector<8x64xf32>
    %cst_29 = arith.constant dense<0.000000e+00> : vector<64x64xf32>
    %72 = tpu.matmul %71, %6, %cst_29 {dimension_numbers = #tpu.dot_dimension_numbers<[0], [0], [1], [1], [0, 1, 1, 1], [], []>, precision = #tpu.contract_precision<fp32>} : vector<8x64xf32>, vector<8x64xf32>, vector<64x64xf32> -> vector<64x64xf32>
    %cst_30 = arith.constant 5.000000e+01 : f32
    %73 = vector.broadcast %cst_30 : f32 to vector<64x64xf32>
    %74 = arith.mulf %73, %72 : vector<64x64xf32>
    %cst_31 = arith.constant dense<0xFF800000> : vector<64xf32>
    %75 = vector.multi_reduction <maximumf>, %74, %cst_31 [0] : vector<64x64xf32> to vector<64xf32>
    %76 = vector.shape_cast %75 : vector<64xf32> to vector<1x64xf32>
    %77 = vector.broadcast %76 : vector<1x64xf32> to vector<64x64xf32>
    %78 = arith.subf %74, %77 : vector<64x64xf32>
    %79 = math.exp %78 : vector<64x64xf32>
    %cst_32 = arith.constant dense<0.000000e+00> : vector<64xf32>
    %80 = vector.multi_reduction <add>, %79, %cst_32 [0] : vector<64x64xf32> to vector<64xf32>
    %81 = vector.shape_cast %80 : vector<64xf32> to vector<1x64xf32>
    %82 = tpu.reciprocal %81 {approx = true} : vector<1x64xf32> -> vector<1x64xf32>
    %83 = arith.mulf %81, %82 : vector<1x64xf32>
    %cst_33 = arith.constant 2.000000e+00 : f32
    %84 = vector.broadcast %cst_33 : f32 to vector<1x64xf32>
    %85 = arith.subf %84, %83 : vector<1x64xf32>
    %86 = arith.mulf %82, %85 : vector<1x64xf32>
    %87 = vector.broadcast %86 : vector<1x64xf32> to vector<64x64xf32>
    %88 = arith.mulf %79, %87 : vector<64x64xf32>
    %89 = vector.extract_strided_slice %7 {offsets = [2, 0], sizes = [1, 64], strides = [1, 1]} : vector<3x64xf32> to vector<1x64xf32>
    %cst_34 = arith.constant dense<0.000000e+00> : vector<1x64xf32>
    %90 = tpu.matmul %89, %88, %cst_34 {dimension_numbers = #tpu.dot_dimension_numbers<[1], [0], [0], [1], [0, 0, 1, 1], [], []>, precision = #tpu.contract_precision<fp32>} : vector<1x64xf32>, vector<64x64xf32>, vector<1x64xf32> -> vector<1x64xf32>
    %c2_35 = arith.constant 2 : index
    %c0_36 = arith.constant 0 : index
    %91 = vector.load %arg7[%c2_35, %c0_36] : memref<3x64xf32, #tpu.memory_space<vmem>>, vector<1x64xf32>
    tpu.vector_store %arg7[%c2_35, %c0_36], %90 {strides = array<i32>} : memref<3x64xf32, #tpu.memory_space<vmem>>, vector<1x64xf32>,
    tpu.wait_dma2 semaphore(%arg9 : memref<!tpu.dma_semaphore, #tpu.memory_space<semaphore_mem>>) src(%arg5 : memref<64x256xf32, #tpu.memory_space<any>>) dst(%arg8 : memref<64x256xf32, #tpu.memory_space<vmem>>)
    %c0_37 = arith.constant 0 : index
    %c0_38 = arith.constant 0 : index
    %92 = vector.load %arg7[%c0_37, %c0_38] : memref<3x64xf32, #tpu.memory_space<vmem>>, vector<3x64xf32>
    %c0_39 = arith.constant 0 : index
    %c0_40 = arith.constant 0 : index
    %93 = vector.load %arg8[%c0_39, %c0_40] : memref<64x256xf32, #tpu.memory_space<vmem>>, vector<64x256xf32>
    %cst_41 = arith.constant dense<0.000000e+00> : vector<3x256xf32>
    %94 = tpu.matmul %92, %93, %cst_41 {dimension_numbers = #tpu.dot_dimension_numbers<[1], [0], [0], [1], [0, 0, 1, 1], [], []>, precision = #tpu.contract_precision<fp32>} : vector<3x64xf32>, vector<64x256xf32>, vector<3x256xf32> -> vector<3x256xf32>
    %cst_42 = arith.constant dense<0.000000e+00> : vector<256xf32>
    %95 = vector.multi_reduction <add>, %94, %cst_42 [0] : vector<3x256xf32> to vector<256xf32>
    %96 = vector.shape_cast %95 : vector<256xf32> to vector<1x256xf32>
    %cst_43 = arith.constant 0.333333343 : f32
    %97 = vector.broadcast %cst_43 : f32 to vector<1x256xf32>
    %98 = arith.mulf %96, %97 : vector<1x256xf32>
    %99 = vector.broadcast %98 : vector<1x256xf32> to vector<3x256xf32>
    %100 = arith.subf %94, %99 : vector<3x256xf32>
    %101 = arith.mulf %100, %100 : vector<3x256xf32>
    %cst_44 = arith.constant dense<0.000000e+00> : vector<256xf32>
    %102 = vector.multi_reduction <add>, %101, %cst_44 [0] : vector<3x256xf32> to vector<256xf32>
    %103 = vector.shape_cast %102 : vector<256xf32> to vector<1x256xf32>
    %cst_45 = arith.constant 5.000000e-01 : f32
    %104 = vector.broadcast %cst_45 : f32 to vector<1x256xf32>
    %105 = arith.mulf %103, %104 : vector<1x256xf32>
    %106 = math.sqrt %105 : vector<1x256xf32>
    %c0_46 = arith.constant 0 : index
    %c0_47 = arith.constant 0 : index
    %107 = vector.load %arg4[%c0_46, %c0_47] : memref<1x256xf32, #tpu.memory_space<vmem>>, vector<1x256xf32>
    %108 = vector.shape_cast %98 : vector<1x256xf32> to vector<1x1x256xf32>
    %cst_48 = arith.constant dense<0xFF800000> : vector<1xf32>
    %109 = vector.multi_reduction <maximumf>, %108, %cst_48 [1, 2] : vector<1x1x256xf32> to vector<1xf32>
    %110 = vector.shape_cast %109 : vector<1xf32> to vector<1x1x1xf32>
    %111 = vector.extract %110[0, 0, 0] : f32 from vector<1x1x1xf32>
    %112 = vector.broadcast %111 : f32 to vector<1x1xf32>
    %113 = vector.shape_cast %107 : vector<1x256xf32> to vector<1x1x256xf32>
    %cst_49 = arith.constant dense<0xFF800000> : vector<1xf32>
    %114 = vector.multi_reduction <maximumf>, %113, %cst_49 [1, 2] : vector<1x1x256xf32> to vector<1xf32>
    %115 = vector.shape_cast %114 : vector<1xf32> to vector<1x1x1xf32>
    %116 = vector.extract %115[0, 0, 0] : f32 from vector<1x1x1xf32>
    %117 = vector.broadcast %116 : f32 to vector<1x1xf32>
    %118 = arith.divf %112, %117 : vector<1x1xf32>
    %119 = arith.divf %117, %112 : vector<1x1xf32>
    %120 = vector.shape_cast %98 : vector<1x256xf32> to vector<1x1x256xf32>
    %cst_50 = arith.constant dense<0.000000e+00> : vector<1xf32>
    %121 = vector.multi_reduction <add>, %120, %cst_50 [1, 2] : vector<1x1x256xf32> to vector<1xf32>
    %122 = vector.shape_cast %121 : vector<1xf32> to vector<1x1x1xf32>
    %123 = vector.extract %122[0, 0, 0] : f32 from vector<1x1x1xf32>
    %124 = vector.broadcast %123 : f32 to vector<1x1xf32>
    %cst_51 = arith.constant 3.906250e-03 : f32
    %125 = vector.broadcast %cst_51 : f32 to vector<1x1xf32>
    %126 = arith.mulf %124, %125 : vector<1x1xf32>
    %127 = vector.shape_cast %107 : vector<1x256xf32> to vector<1x1x256xf32>
    %cst_52 = arith.constant dense<0.000000e+00> : vector<1xf32>
    %128 = vector.multi_reduction <add>, %127, %cst_52 [1, 2] : vector<1x1x256xf32> to vector<1xf32>
    %129 = vector.shape_cast %128 : vector<1xf32> to vector<1x1x1xf32>
    %130 = vector.extract %129[0, 0, 0] : f32 from vector<1x1x1xf32>
    %131 = vector.broadcast %130 : f32 to vector<1x1xf32>
    %cst_53 = arith.constant 3.906250e-03 : f32
    %132 = vector.broadcast %cst_53 : f32 to vector<1x1xf32>
    %133 = arith.mulf %131, %132 : vector<1x1xf32>
    %134 = vector.broadcast %126 : vector<1x1xf32> to vector<1x256xf32>
    %135 = arith.cmpf ogt, %98, %134 : vector<1x256xf32>
    %136 = vector.broadcast %133 : vector<1x1xf32> to vector<1x256xf32>
    %137 = arith.cmpf ogt, %107, %136 : vector<1x256xf32>
    %138 = arith.andi %135, %137 : vector<1x256xi1>
    %cst_54 = arith.constant 5.000000e-02 : f32
    %139 = vector.broadcast %cst_54 : f32 to vector<1x256xf32>
    %140 = arith.maximumf %106, %139 : vector<1x256xf32>
    %141 = arith.mulf %140, %140 : vector<1x256xf32>
    %142 = tpu.reciprocal %141 {approx = true} : vector<1x256xf32> -> vector<1x256xf32>
    %143 = arith.mulf %141, %142 : vector<1x256xf32>
    %cst_55 = arith.constant 2.000000e+00 : f32
    %144 = vector.broadcast %cst_55 : f32 to vector<1x256xf32>
    %145 = arith.subf %144, %143 : vector<1x256xf32>
    %146 = arith.mulf %142, %145 : vector<1x256xf32>
    %cst_56 = arith.constant 9.99999974E-5 : f32
    %147 = vector.broadcast %cst_56 : f32 to vector<1x256xf32>
    %148 = arith.mulf %147, %146 : vector<1x256xf32>
    %cst_57 = arith.constant 1.000000e+00 : f32
    %149 = vector.broadcast %cst_57 : f32 to vector<1x256xf32>
    %150 = arith.subf %149, %148 : vector<1x256xf32>
    %cst_58 = arith.constant 1.000000e+00 : f32
    %151 = vector.broadcast %cst_58 : f32 to vector<1x256xf32>
    %152 = arith.mulf %150, %150 : vector<1x256xf32>
    %153 = arith.mulf %151, %152 : vector<1x256xf32>
    %154 = arith.mulf %152, %152 : vector<1x256xf32>
    %155 = arith.mulf %153, %154 : vector<1x256xf32>
    %156 = arith.mulf %154, %154 : vector<1x256xf32>
    %157 = arith.mulf %156, %156 : vector<1x256xf32>
    %158 = arith.mulf %155, %157 : vector<1x256xf32>
    %159 = arith.mulf %157, %157 : vector<1x256xf32>
    %160 = arith.mulf %159, %159 : vector<1x256xf32>
    %161 = arith.mulf %160, %160 : vector<1x256xf32>
    %162 = arith.mulf %158, %161 : vector<1x256xf32>
    %163 = vector.broadcast %118 : vector<1x1xf32> to vector<1x256xf32>
    %164 = arith.mulf %163, %107 : vector<1x256xf32>
    %165 = arith.subf %164, %98 : vector<1x256xf32>
    %166 = arith.mulf %162, %165 : vector<1x256xf32>
    %167 = arith.addf %98, %166 : vector<1x256xf32>
    %168 = vector.broadcast %119 : vector<1x1xf32> to vector<1x256xf32>
    %169 = arith.mulf %167, %168 : vector<1x256xf32>
    %170 = arith.select %138, %169, %107 : vector<1x256xi1>, vector<1x256xf32>
    %c0_59 = arith.constant 0 : index
    %c0_60 = arith.constant 0 : index
    %171 = vector.load %arg6[%c0_59, %c0_60] : memref<1x256xf32, #tpu.memory_space<vmem>>, vector<1x256xf32>
    tpu.vector_store %arg6[%c0_59, %c0_60], %170 {strides = array<i32>} : memref<1x256xf32, #tpu.memory_space<vmem>>, vector<1x256xf32>,
    return
  }
  func.func @transform_0(%arg0: i32) -> (i32, i32) {
    %c0_i32 = arith.constant 0 : i32
    %c0_i32_0 = arith.constant 0 : i32
    %c0_i32_1 = arith.constant 0 : i32
    return %c0_i32, %c0_i32_0 : i32, i32
  }
  func.func @transform_1(%arg0: i32) -> (i32, i32, i32) {
    %c0_i32 = arith.constant 0 : i32
    %c0_i32_0 = arith.constant 0 : i32
    %c0_i32_1 = arith.constant 0 : i32
    %c0_i32_2 = arith.constant 0 : i32
    return %c0_i32, %c0_i32_0, %c0_i32_1 : i32, i32, i32
  }
  func.func @transform_2(%arg0: i32) -> (i32, i32) {
    %c0_i32 = arith.constant 0 : i32
    %c0_i32_0 = arith.constant 0 : i32
    %c0_i32_1 = arith.constant 0 : i32
    return %c0_i32, %c0_i32_0 : i32, i32
  }
  func.func @transform_3(%arg0: i32) -> (i32, i32) {
    %c0_i32 = arith.constant 0 : i32
    %c0_i32_0 = arith.constant 0 : i32
    %c0_i32_1 = arith.constant 0 : i32
    return %c0_i32, %c0_i32_0 : i32, i32
  }
  func.func @transform_5(%arg0: i32) -> (i32, i32) {
    %c0_i32 = arith.constant 0 : i32
    %c0_i32_0 = arith.constant 0 : i32
    %c0_i32_1 = arith.constant 0 : i32
    return %c0_i32, %c0_i32_0 : i32, i32
  }
}

</mosaic_0001>

<bundles_post_ra>
// kernel: tpu_custom_call.1
= control target key start
LH: loop header
LB: loop body
LE: loop exit
PB: predicated region body
PF: predicated region fallthrough
CT: control target
= control target key end

     0   :  { %10 = vsyncpa [#allocation6], 0  ;;  %s8236_s0 = inlined_call_operand.hbm [shape: f32[8,64], index: 0, kind: input, shape index: {}]   ;;  %s8237_s1 = inlined_call_operand.hbm [shape: f32[3,8,64], index: 1, kind: input, shape index: {}]   ;;  %s8238_s2 = inlined_call_operand.hbm [shape: f32[3,64], index: 2, kind: input, shape index: {}]   ;;  %s8239_s3 = inlined_call_operand.hbm [shape: f32[1,256], index: 3, kind: input, shape index: {}, may-alias: {3,5}]   ;;  %s8240_s4 = inlined_call_operand.hbm [shape: f32[64,256], index: 4, kind: input, shape index: {}]   ;;  %s8241_s5 = inlined_call_operand.hbm [shape: f32[1,256], index: 5, kind: output, shape index: {}, may-alias: {3,5}]  }
   0x1   :  { %11 = vsyncpa [#allocation9], 0 }
   0x2   :  { %12 = vsyncpa [#allocation12], 0 }
   0x3   :  { %13 = vsyncpa [#allocation7], 0  ;;  %s6969_s18 = smov [#allocation8]   ;;  %s6827_s22 = scalar_lea.hbm %s8237_s1, 384 }
   0x4   :  { %s29_s19 = sshll.u32 %s6969_s18, 4  ;;  %p6828_p0 = scmp.ne.s32.totalorder %s8237_s1, %s6827_s22  ;;  %s30_s19 = int_to_ptr.vmem [resolvable:$true] %s29_s19 }
   0x5   :  { %p6831_p1 = scmp.lt.u32.totalorder %s6827_s22, %s8237_s1 }
   0x7   :  { %p6833_p2 = pnand %p6831_p1, %p6828_p0 }
   0x9   :  { %6836 = shalt.err (!%p6833_p2)
}
   0xa   :  { %s6837_s27 = scalar_lea.vmem %s30_s19, 384  ;;  %p6842_p4 = scmp.lt.s32.totalorder %s30_s19, %s30_s19 }
   0xb   :  { %p6838_p3 = scmp.ne.s32.totalorder %s30_s19, %s6837_s27  ;;  %p6843_p5 = scmp.lt.s32.totalorder %s6837_s27, %s6837_s27 }
   0xd   :  { %p6844_p6 = por %p6843_p5, %p6842_p4 }
   0xf   :  { %p6845_p7 = pnand %p6844_p6, %p6838_p3 }
  0x11   :  { %6848 = shalt.err (!%p6845_p7)
}
  0x12   :  { %s6970_s28 = smov 128   ;;  %s6971_s29 = smov 8  }
  0x13   :  { %35 = dma.hbm_to_vmem [thread:$0]  %s8237_s1, 384, %s30_s19, [#allocation9], %s6970_s28, %s6970_s28, %s6971_s29  }
  0x14   :  { %s6972_s7 = smov [#allocation5]   ;;  %s6973_s9 = smov [#allocation10]  }
  0x15   :  { %s20_s8 = sshll.u32 %s6972_s7, 4  ;;  %s42_s10 = sshll.u32 %s6973_s9, 4  ;;  %s21_s8 = int_to_ptr.vmem [resolvable:$true] %s20_s8  ;;  %s43_s10 = int_to_ptr.vmem [resolvable:$true] %s42_s10 }
  0x16   :  { %s6849_s13 = scalar_lea.hbm %s8236_s0, 128 }
  0x17   :  { %p6850_p8 = scmp.ne.s32.totalorder %s8236_s0, %s6849_s13  ;;  %p6853_p9 = scmp.lt.u32.totalorder %s6849_s13, %s8236_s0 }
  0x19   :  { %p6855_p10 = pnand %p6853_p9, %p6850_p8 }
  0x1b   :  { %6858 = shalt.err (!%p6855_p10)
}
  0x1c   :  { %s6859_s1 = scalar_lea.vmem %s21_s8, 128  ;;  %p6864_p12 = scmp.lt.s32.totalorder %s21_s8, %s21_s8 }
  0x1d   :  { %p6860_p11 = scmp.ne.s32.totalorder %s21_s8, %s6859_s1  ;;  %p6865_p13 = scmp.lt.s32.totalorder %s6859_s1, %s6859_s1 }
  0x1f   :  { %p6866_p0 = por %p6865_p13, %p6864_p12 }
  0x21   :  { %p6867_p1 = pnand %p6866_p0, %p6860_p11 }
  0x23   :  { %6870 = shalt.err (!%p6867_p1)
}
  0x24   :  { %23 = dma.hbm_to_vmem [thread:$0]  %s8236_s0, 128, %s21_s8, [#allocation6]  }
  0x25   :  { %s6871_s22 = scalar_lea.hbm %s8238_s2, 64 }
  0x26   :  { %p6872_p2 = scmp.ne.s32.totalorder %s8238_s2, %s6871_s22  ;;  %p6875_p3 = scmp.lt.u32.totalorder %s6871_s22, %s8238_s2 }
  0x28   :  { %p6877_p4 = pnand %p6875_p3, %p6872_p2 }
  0x2a   :  { %6880 = shalt.err (!%p6877_p4)
}
  0x2b   :  { %s6881_s27 = scalar_lea.vmem %s43_s10, 64  ;;  %p6886_p6 = scmp.lt.s32.totalorder %s43_s10, %s43_s10 }
  0x2c   :  { %p6882_p5 = scmp.ne.s32.totalorder %s43_s10, %s6881_s27  ;;  %p6887_p7 = scmp.lt.s32.totalorder %s6881_s27, %s6881_s27 }
  0x2e   :  { %p6888_p8 = por %p6887_p7, %p6886_p6 }
  0x30   :  { %p6889_p9 = pnand %p6888_p8, %p6882_p5 }
  0x32   :  { %6892 = shalt.err (!%p6889_p9)
}
  0x33   :  { %45 = dma.hbm_to_vmem [thread:$0]  %s8238_s2, 64, %s43_s10, [#allocation9]  }
  0x34   :  { %s6974_s29 = smov [#allocation11]   ;;  %s6893_s8 = scalar_lea.hbm %s8239_s3, 32 }
  0x35   :  { %s52_s30 = sshll.u32 %s6974_s29, 4  ;;  %p6894_p10 = scmp.ne.s32.totalorder %s8239_s3, %s6893_s8  ;;  %s53_s30 = int_to_ptr.vmem [resolvable:$true] %s52_s30 }
  0x36   :  { %p6897_p11 = scmp.lt.u32.totalorder %s6893_s8, %s8239_s3 }
  0x38   :  { %p6899_p12 = pnand %p6897_p11, %p6894_p10 }
  0x3a   :  { %6902 = shalt.err (!%p6899_p12)
}
  0x3b   :  { %s6903_s14 = scalar_lea.vmem %s53_s30, 32  ;;  %p6908_p0 = scmp.lt.s32.totalorder %s53_s30, %s53_s30 }
  0x3c   :  { %p6904_p13 = scmp.ne.s32.totalorder %s53_s30, %s6903_s14  ;;  %p6909_p1 = scmp.lt.s32.totalorder %s6903_s14, %s6903_s14 }
  0x3e   :  { %p6910_p2 = por %p6909_p1, %p6908_p0 }
  0x40   :  { %p6911_p3 = pnand %p6910_p2, %p6904_p13 }
  0x42   :  { %6914 = shalt.err (!%p6911_p3)
}
  0x43   :  { %55 = dma.hbm_to_vmem [thread:$0]  %s8239_s3, 32, %s53_s30, [#allocation12]  }
  0x44   :  { %6959 = dma.done.wait [#allocation6], 128  }
  0x45   :  { %6960 = vsyncadd [#allocation6], 4294967168 }
  0x46   :  { %6961 = dma.done.wait [#allocation9], 448  }
  0x47   :  { %6962 = vsyncadd [#allocation9], 4294966848 }
  0x48   :  { %6963 = dma.done.wait [#allocation12], 32  }
  0x49   :  { %6964 = vsyncadd [#allocation12], 4294967264  ;;  %v79_v0 = vld [vmem:[#allocation5] sm:$0xff]  ;;  %vm81_vm0 = vcmask 523264   ;;  %v92_v1 = vld [vmem:[#allocation8] sm:$0xff]  ;;  %vm135_vm1 = vcmask 64512  }
  0x4a   :  { %v80_v2 = vmul.f32 %v79_v0, %v79_v0  ;;  %v93_v3 = vmul.f32 %v92_v1, %v92_v1  ;;  %v1536_v12 = vld [vmem:[#allocation8 + $0x8] sm:$0xff]  ;;  %v2978_v18 = vld [vmem:[#allocation8 + $0x10] sm:$0xff]  ;;  %vm6976_vm2 = vmmov 0   ;;  %vm1533_vm3 = vcmask 516096   ;;  %s6978_s3 = smov [#allocation3]   ;;  %s6915_s1 = scalar_lea.hbm %s8240_s4, 2048 }
  0x4b   :  { %v1537_v15 = vmul.f32 %v1536_v12, %v1536_v12  ;;  %v2979_v21 = vmul.f32 %v2978_v18, %v2978_v18  ;;  %s75_s15 = sshll.u32 %s6978_s3, 4  ;;  %p6916_p4 = scmp.ne.s32.totalorder %s8240_s4, %s6915_s1  ;;  %s76_s15 = int_to_ptr.vmem [resolvable:$true] %s75_s15 }
  0x4c   :  { %v82_v4 = vsel %vm81_vm0, %v80_v2, 0.0  ;;  %v94_v5 = vsel %vm81_vm0, %v93_v3, 0.0  ;;  %p6919_p5 = scmp.lt.u32.totalorder %s6915_s1, %s8240_s4 }
  0x4d   :  { %v83_v6 = vrot.slane %v82_v4, 4  ;;  %v95_v7 = vrot.slane %v94_v5, 4  ;;  %v1538_v22 = vsel %vm81_vm0, %v1537_v15, 0.0  ;;  %v2980_v23 = vsel %vm81_vm0, %v2979_v21, 0.0 }
  0x4e   :  { %v2981_v24 = vrot.slane %v2980_v23, 4  ;;  %v1539_v25 = vrot.slane %v1538_v22, 4  ;;  %p6921_p6 = pnand %p6919_p5, %p6916_p4 }
  0x4f   :  { %v84_v8 = vadd.f32 %v83_v6, %v82_v4  ;;  %v96_v9 = vadd.f32 %v95_v7, %v94_v5 }
  0x50   :  { %v2982_v26 = vadd.f32 %v2981_v24, %v2980_v23  ;;  %v1540_v28 = vadd.f32 %v1539_v25, %v1538_v22 }
  0x51   :  { %v85_v10 = vrot.slane %v84_v8, 2  ;;  %v97_v11 = vrot.slane %v96_v9, 2 }
  0x52   :  { %v2983_v27 = vrot.slane %v2982_v26, 2  ;;  %v1541_v32 = vrot.slane %v1540_v28, 2 }
  0x53   :  { %v86_v13 = vadd.f32 %v85_v10, %v84_v8  ;;  %v98_v14 = vadd.f32 %v97_v11, %v96_v9 }
  0x54   :  { %v2984_v29 = vadd.f32 %v2983_v27, %v2982_v26  ;;  %v1542_v38 = vadd.f32 %v1541_v32, %v1540_v28 }
  0x55   :  { %v87_v16 = vrot.slane %v86_v13, 1  ;;  %v99_v17 = vrot.slane %v98_v14, 1 }
  0x56   :  { %v2985_v30 = vrot.slane %v2984_v29, 1  ;;  %v1543_v39 = vrot.slane %v1542_v38, 1 }
  0x57   :  { %v88_v19 = vadd.f32 %v87_v16, %v86_v13  ;;  %v100_v20 = vadd.f32 %v99_v17, %v98_v14 }
  0x58   :  { %v2986_v35 = vadd.f32 %v2985_v30, %v2984_v29  ;;  %v1544_v40 = vadd.f32 %v1543_v39, %v1542_v38 }
  0x59   :  { %6753 = vrsqrt.f32 %v88_v19 }
  0x5a   :  { %6755 = vrsqrt.f32 %v100_v20 }
  0x5b   :  { %6757 = vrsqrt.f32 %v2986_v35 }
  0x5c   :  { %6759 = vrsqrt.f32 %v1544_v40 }
  0x63   :  { %v6754_v31 = vpop.eup %6753 }
  0x64   :  { %v6756_v33 = vpop.eup %6755  ;;  %v90_v34 = vmul.f32 %v6754_v31, %v79_v0 }
  0x65   :  { %v102_v36 = vmul.f32 %v6756_v33, %v92_v1  ;;  %v6758_v41 = vpop.eup %6757 }
  0x66   :  { %v7064_v37 = vand.u32 4294901760, %v90_v34  ;;  %v2988_v42 = vmul.f32 %v6758_v41, %v2978_v18  ;;  %v6760_v43 = vpop.eup %6759 }
  0x67   :  { %103 = vxpose.xlu0.b32.start.end [1/1] (short) (narrow) %v102_v36, 64  ;;  %v1546_v44 = vmul.f32 %v6760_v43, %v1536_v12 }
  0x68   :  { %5708 = vmatprep.subr.mxu0 %v7064_v37  ;;  %5666 = vmatprep.subr.mxu1 %v7064_v37  ;;  %v7071_v45 = vsub.f32 %v90_v34, %v7064_v37 }
  0x69   :  { %5709 = vmatpush3.msra.mxu0 %v7064_v37  ;;  %5667 = vmatpush3.msra.mxu1 %v7064_v37 }
  0x6a   :  { %2989 = vxpose.xlu1.b32.start.end [1/1] (short) (narrow) %v2988_v42, 64  ;;  %v7074_v46 = vand.u32 4294901760, %v7071_v45 }
  0x6c   :  { %v310_v47 = vsub.f32 %v7071_v45, %v7074_v46  ;;  %5722 = vmatprep.subr.mxu0 %v7074_v46 }
  0x6e   :  { %v7079_v48 = vand.u32 4294901760, %v310_v47 }
  0x70   :  { %5680 = vmatprep.subr.mxu1 %v7079_v48 }
  0x84   :  { %1547 = vxpose.xlu0.b32.start.end [1/1] (short) (narrow) %v1546_v44, 64 }
  0xe7   :  { %v119_v49 = vpop.trf.xlu0 }
  0xe8   :  { %v137_v50 = vsel %vm135_vm1, %v119_v49, 0 }
  0xe9   :  { %v7083_v51 = vand.u32 4294901760, %v137_v50 }
  0xeb   :  { %v7086_v52 = vsub.f32 %v137_v50, %v7083_v51  ;;  %v120_v53 = vpop.trf.xlu0 }
  0xec   :  { %v140_v54 = vsel %vm135_vm1, %v120_v53, 0 }
  0xed   :  { %v7089_v55 = vand.u32 4294901760, %v140_v54  ;;  %v228_v56 = vand.u32 4294901760, %v7086_v52 }
  0xef   :  { %v7093_v57 = vsub.f32 %v140_v54, %v7089_v55  ;;  %5710 = vmatprep.mubr.f32.mxu0 %v228_v56  ;;  %v121_v58 = vpop.trf.xlu0  ;;  %v229_v59 = vsub.f32 %v7086_v52, %v228_v56 }
  0xf0   :  { %v143_v60 = vsel %vm135_vm1, %v121_v58, 0 }
  0xf1   :  { %v7097_v61 = vand.u32 4294901760, %v143_v60  ;;  %v230_v62 = vand.u32 4294901760, %v229_v59  ;;  %v238_v63 = vand.u32 4294901760, %v7093_v57 }
  0xf3   :  { %v7101_v0 = vsub.f32 %v143_v60, %v7097_v61  ;;  %5668 = vmatprep.mubr.f32.mxu1 %v230_v62  ;;  %v122_v1 = vpop.trf.xlu0  ;;  %5711 = vmatmul.mubr.f32.vlgmr.msra.gmra.mrb[0].mxu0 %v238_v63  ;;  %v239_v2 = vsub.f32 %v7093_v57, %v238_v63 }
  0xf4   :  { %v146_v3 = vsel %vm135_vm1, %v122_v1, 0  ;;  %5723 = vmatpush3.msra.mxu0 %v7074_v46 }
  0xf5   :  { %v7106_v4 = vand.u32 4294901760, %v146_v3  ;;  %v240_v5 = vand.u32 4294901760, %v239_v2  ;;  %v248_v6 = vand.u32 4294901760, %v7101_v0  ;;  %5736 = vmatprep.subr.mxu0 %v7064_v37 }
  0xf7   :  { %v7111_v7 = vsub.f32 %v146_v3, %v7106_v4  ;;  %v123_v8 = vpop.trf.xlu0  ;;  %5669 = vmatmul.mubr.f32.vlgmr.msra.gmra.mrb[0].mxu1 %v240_v5  ;;  %5713 = vmatprep.mubr.f32.mxu0 %v248_v6  ;;  %v249_v9 = vsub.f32 %v7101_v0, %v248_v6 }
  0xf8   :  { %v149_v10 = vsel %vm135_vm1, %v123_v8, 0  ;;  %5681 = vmatpush3.msra.mxu1 %v7079_v48 }
  0xf9   :  { %v7116_v11 = vand.u32 4294901760, %v149_v10  ;;  %v250_v12 = vand.u32 4294901760, %v249_v9  ;;  %v258_v13 = vand.u32 4294901760, %v7111_v7  ;;  %5694 = vmatprep.subr.mxu1 %v7071_v45 }
  0xfb   :  { %v7121_v14 = vsub.f32 %v149_v10, %v7116_v11  ;;  %v124_v15 = vpop.trf.xlu0  ;;  %5671 = vmatprep.mubr.f32.mxu1 %v250_v12  ;;  %5714 = vmatmul.mubr.f32.gmra.mrb[2].mxu0 %v258_v13  ;;  %v259_v16 = vsub.f32 %v7111_v7, %v258_v13 }
  0xfc   :  { %v152_v17 = vsel %vm135_vm1, %v124_v15, 0 }
  0xfd   :  { %v7125_v18 = vand.u32 4294901760, %v152_v17  ;;  %v260_v19 = vand.u32 4294901760, %v259_v16  ;;  %v268_v20 = vand.u32 4294901760, %v7121_v14 }
  0xff   :  { %v7129_v21 = vsub.f32 %v152_v17, %v7125_v18  ;;  %v125_v22 = vpop.trf.xlu0  ;;  %5672 = vmatmul.mubr.f32.gmra.mrb[2].mxu1 %v260_v19  ;;  %5716 = vmatprep.mubr.f32.mxu0 %v268_v20  ;;  %v269_v23 = vsub.f32 %v7121_v14, %v268_v20 }
 0x100   :  { %v155_v24 = vsel %vm135_vm1, %v125_v22, 0 }
 0x101   :  { %v7133_v25 = vand.u32 4294901760, %v155_v24  ;;  %v270_v26 = vand.u32 4294901760, %v269_v23  ;;  %v278_v27 = vand.u32 4294901760, %v7129_v21 }
 0x103   :  { %v7137_v28 = vsub.f32 %v155_v24, %v7133_v25  ;;  %v126_v29 = vpop.trf.xlu0  ;;  %5674 = vmatprep.mubr.f32.mxu1 %v270_v26  ;;  %5717 = vmatmul.mubr.f32.gmra.mrb[4].mxu0 %v278_v27  ;;  %v279_v30 = vsub.f32 %v7129_v21, %v278_v27 }
 0x104   :  { %v158_v31 = vsel %vm135_vm1, %v126_v29, 0 }
 0x105   :  { %v7141_v32 = vand.u32 4294901760, %v158_v31  ;;  %v280_v33 = vand.u32 4294901760, %v279_v30  ;;  %v288_v34 = vand.u32 4294901760, %v7137_v28 }
 0x107   :  { %v7145_v35 = vsub.f32 %v158_v31, %v7141_v32  ;;  %5675 = vmatmul.mubr.f32.gmra.mrb[4].mxu1 %v280_v33  ;;  %5719 = vmatprep.mubr.f32.mxu0 %v288_v34  ;;  %v289_v36 = vsub.f32 %v7137_v28, %v288_v34  ;;  %v1563_v38 = vpop.trf.xlu0 }
 0x108   :  { %v1580_v49 = vsel %vm135_vm1, %v1563_v38, 0 }
 0x109   :  { %v290_v39 = vand.u32 4294901760, %v289_v36  ;;  %v298_v40 = vand.u32 4294901760, %v7145_v35  ;;  %v7166_v53 = vand.u32 4294901760, %v1580_v49 }
 0x10b   :  { %5677 = vmatprep.mubr.f32.mxu1 %v290_v39  ;;  %5720 = vmatmul.mubr.f32.gmra.mrb[6].mxu0 %v298_v40  ;;  %v299_v41 = vsub.f32 %v7145_v35, %v298_v40  ;;  %v1564_v42 = vpop.trf.xlu0  ;;  %v7177_v60 = vsub.f32 %v1580_v49, %v7166_v53 }
 0x10c   :  { %5724 = vmatprep.mubr.f32.mxu0 %v7083_v51  ;;  %v1583_v54 = vsel %vm135_vm1, %v1564_v42, 0 }
 0x10d   :  { %v300_v43 = vand.u32 4294901760, %v299_v41  ;;  %v7174_v59 = vand.u32 4294901760, %v1583_v54  ;;  %v1671_v6 = vand.u32 4294901760, %v7177_v60 }
 0x10f   :  { %5678 = vmatmul.mubr.f32.gmra.mrb[6].mxu1 %v300_v43  ;;  %5725 = vmatmul.mubr.f32.vlgmr.msra.gmra.mrb[0].mxu0 %v7089_v55  ;;  %v1565_v44 = vpop.trf.xlu0 }
 0x110   :  { %5682 = vmatprep.mubr.f32.mxu1 %v7083_v51  ;;  %5727 = vmatprep.mubr.f32.mxu0 %v7097_v61  ;;  %v1586_v56 = vsel %vm135_vm1, %v1565_v44, 0 }
 0x111   :  { %5737 = vmatpush3.msra.mxu0 %v7064_v37  ;;  %v7179_v62 = vand.u32 4294901760, %v1586_v56 }
 0x112   :  { %5864 = vmatprep.subr.mxu0 %v7064_v37 }
 0x113   :  { %5683 = vmatmul.mubr.f32.vlgmr.msra.gmra.mrb[0].mxu1 %v7089_v55  ;;  %5728 = vmatmul.mubr.f32.gmra.mrb[2].mxu0 %v7106_v4  ;;  %v1566_v47 = vpop.trf.xlu0 }
 0x114   :  { %5695 = vmatpush3.msra.mxu1 %v7071_v45  ;;  %5685 = vmatprep.mubr.f32.mxu1 %v7097_v61  ;;  %v1589_v63 = vsel %vm135_vm1, %v1566_v47, 0 }
 0x115   :  { %5730 = vmatprep.mubr.f32.mxu0 %v7116_v11  ;;  %v7190_v3 = vand.u32 4294901760, %v1589_v63 }
 0x117   :  { %5686 = vmatmul.mubr.f32.gmra.mrb[2].mxu1 %v7106_v4  ;;  %5731 = vmatmul.mubr.f32.gmra.mrb[4].mxu0 %v7125_v18  ;;  %v1567_v50 = vpop.trf.xlu0  ;;  %v7211_v13 = vsub.f32 %v1589_v63, %v7190_v3 }
 0x118   :  { %5688 = vmatprep.mubr.f32.mxu1 %v7116_v11  ;;  %5733 = vmatprep.mubr.f32.mxu0 %v7133_v25  ;;  %v1592_v1 = vsel %vm135_vm1, %v1567_v50, 0 }
 0x119   :  { %v7198_v8 = vand.u32 4294901760, %v1592_v1  ;;  %v1701_v19 = vand.u32 4294901760, %v7211_v13 }
 0x11b   :  { %5689 = vmatmul.mubr.f32.gmra.mrb[4].mxu1 %v7125_v18  ;;  %5734 = vmatmul.mubr.f32.gmra.mrb[6].mxu0 %v7141_v32  ;;  %v1568_v58 = vpop.trf.xlu0  ;;  %v1702_v26 = vsub.f32 %v7211_v13, %v1701_v19 }
 0x11c   :  { %5691 = vmatprep.mubr.f32.mxu1 %v7133_v25  ;;  %5738 = vmatprep.mubr.f32.mxu0 %v7083_v51  ;;  %v7188_v51 = vsub.f32 %v1583_v54, %v7174_v59 }
 0x11d   :  { %v1703_v31 = vand.u32 4294901760, %v1702_v26 }
 0x11e   :  { %v1681_v12 = vand.u32 4294901760, %v7188_v51 }
 0x11f   :  { %5692 = vmatmul.mubr.f32.gmra.mrb[6].mxu1 %v7141_v32  ;;  %5739 = vmatmul.mubr.f32.vlgmr.msra.gmra.mrb[0].mxu0 %v7089_v55  ;;  %v1569_v2 = vpop.trf.xlu0  ;;  %v7196_v55 = vsub.f32 %v1586_v56, %v7179_v62 }
 0x120   :  { %5696 = vmatprep.mubr.f32.mxu1 %v7086_v52  ;;  %5741 = vmatprep.mubr.f32.mxu0 %v7097_v61  ;;  %v1598_v5 = vsel %vm135_vm1, %v1569_v2, 0  ;;  %v1595_v52 = vsel %vm135_vm1, %v1568_v58, 0  ;;  %v1682_v17 = vsub.f32 %v7188_v51, %v1681_v12 }
 0x121   :  { %5865 = vmatpush3.msra.mxu0 %v7064_v37  ;;  %v7206_v9 = vand.u32 4294901760, %v1598_v5  ;;  %v7213_v15 = vand.u32 4294901760, %v1595_v52 }
 0x122   :  { %5878 = vmatprep.subr.mxu0 %v7079_v48  ;;  %v1683_v24 = vand.u32 4294901760, %v1682_v17 }
 0x123   :  { %5697 = vmatmul.mubr.f32.vlgmr.msra.gmra.mrb[0].mxu1 %v7093_v57  ;;  %5742 = vmatmul.mubr.f32.gmra.mrb[2].mxu0 %v7106_v4  ;;  %v1570_v61 = vpop.trf.xlu0  ;;  %v1691_v57 = vand.u32 4294901760, %v7196_v55  ;;  %v7217_v4 = vsub.f32 %v1592_v1, %v7198_v8  ;;  %v7229_v16 = vsub.f32 %v1598_v5, %v7206_v9  ;;  %v7236_v20 = vsub.f32 %v1595_v52, %v7213_v15 }
 0x124   :  { %5699 = vmatprep.mubr.f32.mxu1 %v7101_v0  ;;  %5744 = vmatprep.mubr.f32.mxu0 %v7116_v11  ;;  %v1601_v10 = vsel %vm135_vm1, %v1570_v61, 0  ;;  %v1672_v0 = vsub.f32 %v7177_v60, %v1671_v6 }
 0x125   :  { %v7224_v11 = vand.u32 4294901760, %v1601_v10  ;;  %v1731_v23 = vand.u32 4294901760, %v7229_v16 }
 0x127   :  { %5700 = vmatmul.mubr.f32.gmra.mrb[2].mxu1 %v7111_v7  ;;  %5745 = vmatmul.mubr.f32.gmra.mrb[4].mxu0 %v7125_v18  ;;  %v1711_v7 = vand.u32 4294901760, %v7217_v4  ;;  %v1673_v18 = vand.u32 4294901760, %v1672_v0  ;;  %v1740_v22 = vsub.f32 %v1601_v10, %v7224_v11 }
 0x128   :  { %5702 = vmatprep.mubr.f32.mxu1 %v7121_v14  ;;  %5747 = vmatprep.mubr.f32.mxu0 %v7133_v25  ;;  %v1692_v14 = vsub.f32 %v7196_v55, %v1691_v57  ;;  %v1721_v25 = vand.u32 4294901760, %v7236_v20 }
 0x129   :  { %v1712_v29 = vsub.f32 %v7217_v4, %v1711_v7  ;;  %v1741_v30 = vand.u32 4294901760, %v1740_v22 }
 0x12a   :  { %v1693_v27 = vand.u32 4294901760, %v1692_v14 }
 0x12b   :  { %5703 = vmatmul.mubr.f32.gmra.mrb[4].mxu1 %v7129_v21  ;;  %5748 = vmatmul.mubr.f32.gmra.mrb[6].mxu0 %v7141_v32  ;;  %v1732_v21 = vsub.f32 %v7229_v16, %v1731_v23  ;;  %v1713_v32 = vand.u32 4294901760, %v1712_v29  ;;  %v1742_v33 = vsub.f32 %v1740_v22, %v1741_v30 }
 0x12c   :  { %5705 = vmatprep.mubr.f32.mxu1 %v7137_v28  ;;  %5866 = vmatprep.mubr.f32.mxu0 %v1673_v18  ;;  %v1722_v28 = vsub.f32 %v7236_v20, %v1721_v25 }
 0x12d   :  { %v1733_v34 = vand.u32 4294901760, %v1732_v21  ;;  %v1743_v38 = vand.u32 4294901760, %v1742_v33 }
 0x12e   :  { %v1723_v36 = vand.u32 4294901760, %v1722_v28 }
 0x12f   :  { %5706 = vmatmul.mubr.f32.gmra.mrb[6].mxu1 %v7145_v35  ;;  %5867 = vmatmul.mubr.f32.vlgmr.msra.gmra.mrb[8].mxu0 %v1683_v24  ;;  %v3005_v35 = vpop.trf.xlu1 }
 0x130   :  { %5869 = vmatprep.mubr.f32.mxu0 %v1693_v27  ;;  %5879 = vmatpush3.msra.mxu0 %v7079_v48  ;;  %v3022_v44 = vsel %vm135_vm1, %v3005_v35, 0 }
 0x131   :  { %5892 = vmatprep.subr.mxu0 %v7071_v45  ;;  %v7292_v47 = vand.u32 4294901760, %v3022_v44 }
 0x133   :  { %5870 = vmatmul.mubr.f32.gmra.mrb[10].mxu0 %v1703_v31  ;;  %v3006_v39 = vpop.trf.xlu1  ;;  %v7301_v58 = vsub.f32 %v3022_v44, %v7292_v47 }
 0x134   :  { %5872 = vmatprep.mubr.f32.mxu0 %v1713_v32  ;;  %v3025_v49 = vsel %vm135_vm1, %v3006_v39, 0 }
 0x135   :  { %v7298_v56 = vand.u32 4294901760, %v3025_v49 }
 0x137   :  { %5873 = vmatmul.mubr.f32.gmra.mrb[12].mxu0 %v1723_v36  ;;  %v3007_v40 = vpop.trf.xlu1  ;;  %v7311_v2 = vsub.f32 %v3025_v49, %v7298_v56 }
 0x138   :  { %5875 = vmatprep.mubr.f32.mxu0 %v1733_v34  ;;  %v3028_v50 = vsel %vm135_vm1, %v3007_v40, 0 }
 0x139   :  { %v3123_v10 = vand.u32 4294901760, %v7311_v2 }
 0x13b   :  { %5876 = vmatmul.mubr.f32.gmra.mrb[14].mxu0 %v1743_v38  ;;  %v3008_v41 = vpop.trf.xlu1 }
 0x13c   :  { %5880 = vmatprep.mubr.f32.mxu0 %v7166_v53  ;;  %v3031_v63 = vsel %vm135_vm1, %v3008_v41, 0 }
 0x13f   :  { %5881 = vmatmul.mubr.f32.vlgmr.msra.gmra.mrb[8].mxu0 %v7174_v59  ;;  %v3009_v42 = vpop.trf.xlu1 }
 0x140   :  { %5883 = vmatprep.mubr.f32.mxu0 %v7179_v62  ;;  %5893 = vmatpush3.msra.mxu0 %v7071_v45  ;;  %v3034_v1 = vsel %vm135_vm1, %v3009_v42, 0 }
 0x141   :  { %5906 = vmatprep.subr.mxu0 %v7064_v37 }
 0x143   :  { %5884 = vmatmul.mubr.f32.gmra.mrb[10].mxu0 %v7190_v3  ;;  %v3010_v43 = vpop.trf.xlu1 }
 0x144   :  { %5886 = vmatprep.mubr.f32.mxu0 %v7198_v8 }
 0x147   :  { %5887 = vmatmul.mubr.f32.gmra.mrb[12].mxu0 %v7213_v15  ;;  %v3011_v54 = vpop.trf.xlu1 }
 0x148   :  { %5889 = vmatprep.mubr.f32.mxu0 %v7206_v9 }
 0x14b   :  { %5890 = vmatmul.mubr.f32.gmra.mrb[14].mxu0 %v7224_v11  ;;  %v3012_v5 = vpop.trf.xlu1 }
 0x14c   :  { %5894 = vmatprep.mubr.f32.mxu0 %v7177_v60  ;;  %v7303_v60 = vand.u32 4294901760, %v3028_v50  ;;  %v3043_v61 = vsel %vm135_vm1, %v3012_v5, 0 }
 0x14f   :  { %5895 = vmatmul.mubr.f32.vlgmr.msra.gmra.mrb[8].mxu0 %v7188_v51  ;;  %v3040_v51 = vsel %vm135_vm1, %v3011_v54, 0 }
 0x150   :  { %5897 = vmatprep.mubr.f32.mxu0 %v7196_v55  ;;  %5907 = vmatpush3.msra.mxu0 %v7064_v37  ;;  %v7321_v55 = vand.u32 4294901760, %v3034_v1  ;;  %v7326_v52 = vand.u32 4294901760, %v3040_v51 }
 0x151   :  { %5920 = vmatprep.subr.mxu0 %v7074_v46 }
 0x152   :  { %v3172_v0 = vsub.f32 %v3040_v51, %v7326_v52 }
 0x153   :  { %5898 = vmatmul.mubr.f32.gmra.mrb[10].mxu0 %v7211_v13 }
 0x154   :  { %5900 = vmatprep.mubr.f32.mxu0 %v7217_v4  ;;  %v7337_v4 = vsub.f32 %v3034_v1, %v7321_v55 }
 0x157   :  { %5901 = vmatmul.mubr.f32.gmra.mrb[12].mxu0 %v7236_v20  ;;  %v3153_v20 = vand.u32 4294901760, %v7337_v4 }
 0x158   :  { %5903 = vmatprep.mubr.f32.mxu0 %v7229_v16  ;;  %v3124_v16 = vsub.f32 %v7311_v2, %v3123_v10 }
 0x15a   :  { %v3125_v14 = vand.u32 4294901760, %v3124_v16 }
 0x15b   :  { %5904 = vmatmul.mubr.f32.gmra.mrb[14].mxu0 %v1740_v22 }
 0x15c   :  { %5908 = vmatprep.mubr.f32.mxu0 %v1671_v6  ;;  %v3113_v6 = vand.u32 4294901760, %v7301_v58 }
 0x15f   :  { %5909 = vmatmul.mubr.f32.vlgmr.msra.gmra.mrb[8].mxu0 %v1681_v12 }
 0x160   :  { %5911 = vmatprep.mubr.f32.mxu0 %v1691_v57  ;;  %5921 = vmatpush3.msra.mxu0 %v7074_v46 }
 0x161   :  { %5934 = vmatprep.subr.mxu0 %v7064_v37 }
 0x163   :  { %5912 = vmatmul.mubr.f32.gmra.mrb[10].mxu0 %v1701_v19 }
 0x164   :  { %5914 = vmatprep.mubr.f32.mxu0 %v1711_v7 }
 0x167   :  { %5915 = vmatmul.mubr.f32.gmra.mrb[12].mxu0 %v1721_v25  ;;  %v3154_v25 = vsub.f32 %v7337_v4, %v3153_v20 }
 0x168   :  { %5917 = vmatprep.mubr.f32.mxu0 %v1731_v23 }
 0x16b   :  { %5918 = vmatmul.mubr.f32.gmra.mrb[14].mxu0 %v1741_v30 }
 0x16c   :  { %5922 = vmatprep.mubr.f32.mxu0 %v7166_v53 }
 0x16f   :  { %5923 = vmatmul.mubr.f32.vlgmr.msra.gmra.mrb[8].mxu0 %v7174_v59 }
 0x170   :  { %5925 = vmatprep.mubr.f32.mxu0 %v7179_v62  ;;  %5935 = vmatpush3.msra.mxu0 %v7064_v37 }
 0x171   :  { %6062 = vmatprep.subr.mxu0 %v7064_v37 }
 0x173   :  { %5926 = vmatmul.mubr.f32.gmra.mrb[10].mxu0 %v7190_v3 }
 0x174   :  { %5928 = vmatprep.mubr.f32.mxu0 %v7198_v8 }
 0x177   :  { %5929 = vmatmul.mubr.f32.gmra.mrb[12].mxu0 %v7213_v15 }
 0x178   :  { %5931 = vmatprep.mubr.f32.mxu0 %v7206_v9 }
 0x17b   :  { %5932 = vmatmul.mubr.f32.gmra.mrb[14].mxu0 %v7224_v11 }
 0x17c   :  { %5936 = vmatprep.mubr.f32.mxu0 %v7166_v53  ;;  %v7313_v53 = vand.u32 4294901760, %v3031_v63 }
 0x17e   :  { %v7331_v12 = vsub.f32 %v3031_v63, %v7313_v53 }
 0x17f   :  { %5937 = vmatmul.mubr.f32.vlgmr.msra.gmra.mrb[8].mxu0 %v7174_v59  ;;  %v7319_v59 = vsub.f32 %v3028_v50, %v7303_v60 }
 0x180   :  { %5939 = vmatprep.mubr.f32.mxu0 %v7179_v62  ;;  %6063 = vmatpush3.msra.mxu0 %v7064_v37  ;;  %v3037_v62 = vsel %vm135_vm1, %v3010_v43, 0  ;;  %v3143_v17 = vand.u32 4294901760, %v7331_v12 }
 0x181   :  { %6076 = vmatprep.subr.mxu0 %v7079_v48  ;;  %v7333_v13 = vand.u32 4294901760, %v3037_v62  ;;  %v3133_v57 = vand.u32 4294901760, %v7319_v59 }
 0x182   :  { %v3144_v23 = vsub.f32 %v7331_v12, %v3143_v17 }
 0x183   :  { %5940 = vmatmul.mubr.f32.gmra.mrb[10].mxu0 %v7190_v3  ;;  %v3114_v3 = vsub.f32 %v7301_v58, %v3113_v6  ;;  %v3162_v19 = vsub.f32 %v3037_v62, %v7333_v13  ;;  %v3134_v18 = vsub.f32 %v7319_v59, %v3133_v57 }
 0x184   :  { %5942 = vmatprep.mubr.f32.mxu0 %v7198_v8  ;;  %v7343_v8 = vand.u32 4294901760, %v3043_v61  ;;  %v3145_v29 = vand.u32 4294901760, %v3144_v23 }
 0x185   :  { %v3115_v7 = vand.u32 4294901760, %v3114_v3  ;;  %v3163_v22 = vand.u32 4294901760, %v3162_v19  ;;  %v3135_v24 = vand.u32 4294901760, %v3134_v18 }
 0x187   :  { %5943 = vmatmul.mubr.f32.gmra.mrb[12].mxu0 %v7213_v15  ;;  %v3182_v15 = vsub.f32 %v3043_v61, %v7343_v8  ;;  %v3164_v30 = vsub.f32 %v3162_v19, %v3163_v22 }
 0x188   :  { %5945 = vmatprep.mubr.f32.mxu0 %v7206_v9  ;;  %v3173_v9 = vand.u32 4294901760, %v3172_v0 }
 0x189   :  { %v3183_v26 = vand.u32 4294901760, %v3182_v15  ;;  %v3165_v28 = vand.u32 4294901760, %v3164_v30 }
 0x18a   :  { %v3174_v27 = vsub.f32 %v3172_v0, %v3173_v9 }
 0x18b   :  { %5946 = vmatmul.mubr.f32.gmra.mrb[14].mxu0 %v7224_v11  ;;  %v3155_v11 = vand.u32 4294901760, %v3154_v25  ;;  %v3184_v21 = vsub.f32 %v3182_v15, %v3183_v26 }
 0x18c   :  { %6064 = vmatprep.mubr.f32.mxu0 %v3115_v7  ;;  %v3175_v31 = vand.u32 4294901760, %v3174_v27 }
 0x18d   :  { %v3185_v32 = vand.u32 4294901760, %v3184_v21 }
 0x18f   :  { %6065 = vmatmul.mubr.f32.vlgmr.msra.gmra.mrb[16].mxu0 %v3125_v14 }
 0x190   :  { %6067 = vmatprep.mubr.f32.mxu0 %v3135_v24  ;;  %6077 = vmatpush3.msra.mxu0 %v7079_v48  ;;  %v6977_v48 = vmov 0.0  }
 0x191   :  { %6090 = vmatprep.subr.mxu0 %v7071_v45  ;;  %5766 = vmatprep.mubr.msk.f32.mxu1 %vm6976_vm2, %v6977_v48 }
 0x193   :  { %6068 = vmatmul.mubr.f32.gmra.mrb[18].mxu0 %v3145_v29 }
 0x194   :  { %6070 = vmatprep.mubr.f32.mxu0 %v3155_v11 }
 0x197   :  { %6071 = vmatmul.mubr.f32.gmra.mrb[20].mxu0 %v3165_v28 }
 0x198   :  { %6073 = vmatprep.mubr.f32.mxu0 %v3175_v31 }
 0x19b   :  { %6074 = vmatmul.mubr.f32.gmra.mrb[22].mxu0 %v3185_v32 }
 0x19c   :  { %6078 = vmatprep.mubr.f32.mxu0 %v7292_v47 }
 0x19f   :  { %6079 = vmatmul.mubr.f32.vlgmr.msra.gmra.mrb[16].mxu0 %v7298_v56 }
 0x1a0   :  { %6081 = vmatprep.mubr.f32.mxu0 %v7303_v60  ;;  %6091 = vmatpush3.msra.mxu0 %v7071_v45  ;;  %v6975_v45 = vmov 0.0|0.0  }
 0x1a1   :  { %6104 = vmatprep.subr.mxu0 %v7064_v37  ;;  %6260 = vmatprep.subr.bf16.mxu1 %v6975_v45 }
 0x1a3   :  { %6082 = vmatmul.mubr.f32.gmra.mrb[18].mxu0 %v7313_v53 }
 0x1a4   :  { %6084 = vmatprep.mubr.f32.mxu0 %v7321_v55 }
 0x1a7   :  { %6085 = vmatmul.mubr.f32.gmra.mrb[20].mxu0 %v7333_v13 }
 0x1a8   :  { %6087 = vmatprep.mubr.f32.mxu0 %v7326_v52 }
 0x1ab   :  { %6088 = vmatmul.mubr.f32.gmra.mrb[22].mxu0 %v7343_v8 }
 0x1ac   :  { %6092 = vmatprep.mubr.f32.mxu0 %v7301_v58 }
 0x1af   :  { %6093 = vmatmul.mubr.f32.vlgmr.msra.gmra.mrb[16].mxu0 %v7311_v2 }
 0x1b0   :  { %6095 = vmatprep.mubr.f32.mxu0 %v7319_v59  ;;  %6105 = vmatpush3.msra.mxu0 %v7064_v37 }
 0x1b1   :  { %6118 = vmatprep.subr.mxu0 %v7074_v46 }
 0x1b3   :  { %6096 = vmatmul.mubr.f32.gmra.mrb[18].mxu0 %v7331_v12 }
 0x1b4   :  { %6098 = vmatprep.mubr.f32.mxu0 %v7337_v4 }
 0x1b7   :  { %6099 = vmatmul.mubr.f32.gmra.mrb[20].mxu0 %v3162_v19 }
 0x1b8   :  { %6101 = vmatprep.mubr.f32.mxu0 %v3172_v0 }
 0x1bb   :  { %6102 = vmatmul.mubr.f32.gmra.mrb[22].mxu0 %v3182_v15 }
 0x1bc   :  { %6106 = vmatprep.mubr.f32.mxu0 %v3113_v6 }
 0x1bf   :  { %6107 = vmatmul.mubr.f32.vlgmr.msra.gmra.mrb[16].mxu0 %v3123_v10 }
 0x1c0   :  { %6109 = vmatprep.mubr.f32.mxu0 %v3133_v57  ;;  %6119 = vmatpush3.msra.mxu0 %v7074_v46 }
 0x1c1   :  { %6132 = vmatprep.subr.mxu0 %v7064_v37 }
 0x1c3   :  { %6110 = vmatmul.mubr.f32.gmra.mrb[18].mxu0 %v3143_v17 }
 0x1c4   :  { %6112 = vmatprep.mubr.f32.mxu0 %v3153_v20 }
 0x1c7   :  { %6113 = vmatmul.mubr.f32.gmra.mrb[20].mxu0 %v3163_v22 }
 0x1c8   :  { %6115 = vmatprep.mubr.f32.mxu0 %v3173_v9 }
 0x1cb   :  { %6116 = vmatmul.mubr.f32.gmra.mrb[22].mxu0 %v3183_v26 }
 0x1cc   :  { %6120 = vmatprep.mubr.f32.mxu0 %v7292_v47 }
 0x1cf   :  { %6121 = vmatmul.mubr.f32.vlgmr.msra.gmra.mrb[16].mxu0 %v7298_v56 }
 0x1d0   :  { %6123 = vmatprep.mubr.f32.mxu0 %v7303_v60  ;;  %6133 = vmatpush3.msra.mxu0 %v7064_v37 }
 0x1d3   :  { %6124 = vmatmul.mubr.f32.gmra.mrb[18].mxu0 %v7313_v53 }
 0x1d4   :  { %6126 = vmatprep.mubr.f32.mxu0 %v7321_v55 }
 0x1d7   :  { %6127 = vmatmul.mubr.f32.gmra.mrb[20].mxu0 %v7333_v13 }
 0x1d8   :  { %6129 = vmatprep.mubr.f32.mxu0 %v7326_v52 }
 0x1db   :  { %6130 = vmatmul.mubr.f32.gmra.mrb[22].mxu0 %v7343_v8 }
 0x1dc   :  { %6134 = vmatprep.mubr.f32.mxu0 %v7292_v47 }
 0x1df   :  { %6135 = vmatmul.mubr.f32.vlgmr.msra.gmra.mrb[16].mxu0 %v7298_v56 }
 0x1e0   :  { %6137 = vmatprep.mubr.f32.mxu0 %v7303_v60 }
 0x1e3   :  { %6138 = vmatmul.mubr.f32.gmra.mrb[18].mxu0 %v7313_v53 }
 0x1e4   :  { %6140 = vmatprep.mubr.f32.mxu0 %v7321_v55 }
 0x1e7   :  { %6141 = vmatmul.mubr.f32.gmra.mrb[20].mxu0 %v7333_v13 }
 0x1e8   :  { %6143 = vmatprep.mubr.f32.mxu0 %v7326_v52 }
 0x1eb   :  { %6144 = vmatmul.mubr.f32.gmra.mrb[22].mxu0 %v7343_v8 }
 0x1f2   :  { %v5740_v37 = vpop.f32.mrb[0].mxu0 }
 0x1f3   :  { %v861_v46 = vpop.f32.mrb[1].mxu0 }
 0x1f6   :  { %v5698_v33 = vpop.f32.mrb[0].mxu1  ;;  %v5743_v34 = vpop.f32.mrb[2].mxu0 }
 0x1f7   :  { %v6572_v36 = vadd.f32 %v5740_v37, %v5698_v33  ;;  %v494_v38 = vpop.f32.mrb[1].mxu1  ;;  %v873_v35 = vpop.f32.mrb[3].mxu0 }
 0x1f8   :  { %v6573_v39 = vadd.f32 %v861_v46, %v494_v38 }
 0x1f9   :  { %v908_v49 = vmul.f32 50.0, %v6572_v36 }
 0x1fa   :  { %v5701_v40 = vpop.f32.mrb[2].mxu1  ;;  %v5746_v41 = vpop.f32.mrb[4].mxu0  ;;  %v907_v56 = vmul.f32 50.0, %v6573_v39 }
 0x1fb   :  { %v6574_v42 = vadd.f32 %v5743_v34, %v5701_v40  ;;  %v508_v43 = vpop.f32.mrb[3].mxu1  ;;  %v885_v44 = vpop.f32.mrb[5].mxu0  ;;  %v916_v53 = vsel %vm81_vm0, %v908_v49, -inf }
 0x1fc   :  { %v6575_v47 = vadd.f32 %v873_v35, %v508_v43  ;;  %v915_v6 = vsel %vm81_vm0, %v907_v56, -inf }
 0x1fd   :  { %v910_v59 = vmul.f32 50.0, %v6574_v42 }
 0x1fe   :  { %v5704_v50 = vpop.f32.mrb[4].mxu1  ;;  %v5749_v54 = vpop.f32.mrb[6].mxu0  ;;  %v909_v61 = vmul.f32 50.0, %v6575_v47 }
 0x1ff   :  { %v6576_v58 = vadd.f32 %v5746_v41, %v5704_v50  ;;  %v522_v60 = vpop.f32.mrb[5].mxu1  ;;  %v897_v63 = vpop.f32.mrb[7].mxu0  ;;  %v918_v8 = vsel %vm81_vm0, %v910_v59, -inf }
 0x200   :  { %v6577_v1 = vadd.f32 %v885_v44, %v522_v60  ;;  %v917_v17 = vsel %vm81_vm0, %v909_v61, -inf }
 0x201   :  { %v912_v2 = vmul.f32 50.0, %v6576_v58 }
 0x202   :  { %v911_v51 = vmul.f32 50.0, %v6577_v1  ;;  %v5707_v5 = vpop.f32.mrb[6].mxu1 }
 0x203   :  { %v921_v55 = vsel %vm81_vm0, %v912_v2, -inf  ;;  %v6578_v62 = vadd.f32 %v5749_v54, %v5707_v5  ;;  %v536_v52 = vpop.f32.mrb[7].mxu1 }
 0x204   :  { %v922_v10 = vmax.f32 %v916_v53, %v921_v55  ;;  %v919_v12 = vsel %vm81_vm0, %v911_v51, -inf  ;;  %v6579_v13 = vadd.f32 %v897_v63, %v536_v52 }
 0x205   :  { %v920_v57 = vmax.f32 %v915_v6, %v919_v12  ;;  %v914_v4 = vmul.f32 50.0, %v6578_v62 }
 0x206   :  { %v913_v3 = vmul.f32 50.0, %v6579_v13  ;;  %v7425_v13 = vld [vmem:[#allocation10] sm:$0x7] }
 0x207   :  { %v927_v0 = vmax.f32 %v920_v57, %v922_v10  ;;  %v925_v16 = vsel %vm81_vm0, %v914_v4, -inf }
 0x208   :  { %v926_v19 = vmax.f32 %v918_v8, %v925_v16  ;;  %v923_v20 = vsel %vm81_vm0, %v913_v3, -inf }
 0x209   :  { %v924_v7 = vmax.f32 %v917_v17, %v923_v20 }
 0x20b   :  { %v928_v18 = vmax.f32 %v924_v7, %v926_v19 }
 0x20d   :  { %v929_v15 = vmax.f32 %v927_v0, %v928_v18 }
 0x20f   :  { %v930_v9 = vrot.slane %v929_v15, 4 }
 0x211   :  { %v931_v14 = vmax.f32 %v929_v15, %v930_v9 }
 0x213   :  { %v932_v22 = vrot.slane %v931_v14, 2 }
 0x215   :  { %v933_v23 = vmax.f32 %v931_v14, %v932_v22 }
 0x217   :  { %v934_v24 = vrot.slane %v933_v23, 1 }
 0x219   :  { %v935_v25 = vmax.f32 %v933_v23, %v934_v24 }
 0x21b   :  { %v936_v26 = vsub.f32 %v907_v56, %v935_v25  ;;  %v937_v27 = vsub.f32 %v908_v49, %v935_v25  ;;  %v938_v29 = vsub.f32 %v909_v61, %v935_v25  ;;  %v939_v30 = vsub.f32 %v910_v59, %v935_v25 }
 0x21c   :  { %v940_v11 = vsub.f32 %v911_v51, %v935_v25  ;;  %v941_v21 = vsub.f32 %v912_v2, %v935_v25  ;;  %v942_v31 = vsub.f32 %v913_v3, %v935_v25  ;;  %v943_v28 = vsub.f32 %v914_v4, %v935_v25 }
 0x21d   :  { %v944_v32 = vmul.f32 1.442695, %v936_v26  ;;  %v946_v37 = vmul.f32 1.442695, %v937_v27  ;;  %v948_v46 = vmul.f32 1.442695, %v938_v29 }
 0x21e   :  { %v950_v33 = vmul.f32 1.442695, %v939_v30  ;;  %v952_v34 = vmul.f32 1.442695, %v940_v11  ;;  %v954_v36 = vmul.f32 1.442695, %v941_v21 }
 0x21f   :  { %6761 = vpow2.f32 %v944_v32  ;;  %v956_v38 = vmul.f32 1.442695, %v942_v31  ;;  %v958_v35 = vmul.f32 1.442695, %v943_v28  ;;  %v994_v4 = vsel %vm81_vm0, %v7425_v13, 0 }
 0x220   :  { %6763 = vpow2.f32 %v946_v37  ;;  %v7429_v8 = vand.u32 4294901760, %v994_v4 }
 0x221   :  { %6765 = vpow2.f32 %v948_v46 }
 0x222   :  { %6767 = vpow2.f32 %v950_v33  ;;  %v7432_v0 = vsub.f32 %v994_v4, %v7429_v8 }
 0x223   :  { %6769 = vpow2.f32 %v952_v34 }
 0x224   :  { %6771 = vpow2.f32 %v954_v36  ;;  %v1071_v16 = vand.u32 4294901760, %v7432_v0 }
 0x225   :  { %6773 = vpow2.f32 %v956_v38 }
 0x226   :  { %6775 = vpow2.f32 %v958_v35  ;;  %v7438_v7 = vsub.f32 %v7432_v0, %v1071_v16 }
 0x228   :  { %v1073_v26 = vand.u32 4294901760, %v7438_v7 }
 0x229   :  { %v6762_v39 = vpop.eup %6761 }
 0x22a   :  { %v6764_v40 = vpop.eup %6763  ;;  %v960_v41 = vsel %vm81_vm0, %v6762_v39, 0.0 }
 0x22b   :  { %v6766_v42 = vpop.eup %6765  ;;  %v961_v43 = vsel %vm81_vm0, %v6764_v40, 0.0 }
 0x22c   :  { %v6768_v44 = vpop.eup %6767  ;;  %v962_v47 = vadd.f32 %v961_v43, %v960_v41  ;;  %v963_v49 = vsel %vm81_vm0, %v6766_v42, 0.0 }
 0x22d   :  { %v6770_v50 = vpop.eup %6769  ;;  %v965_v56 = vsel %vm81_vm0, %v6768_v44, 0.0 }
 0x22e   :  { %v964_v54 = vadd.f32 %v963_v49, %v962_v47  ;;  %v6772_v58 = vpop.eup %6771  ;;  %v967_v63 = vsel %vm81_vm0, %v6770_v50, 0.0 }
 0x22f   :  { %v7416_v1 = vpop.eup %6773  ;;  %v969_v53 = vsel %vm81_vm0, %v6772_v58, 0.0 }
 0x230   :  { %v966_v60 = vadd.f32 %v965_v56, %v964_v54  ;;  %v7419_v51 = vpop.eup %6775  ;;  %v971_v6 = vsel %vm81_vm0, %v7416_v1, 0.0 }
 0x231   :  { %v973_v55 = vsel %vm81_vm0, %v7419_v51, 0.0 }
 0x232   :  { %v968_v2 = vadd.f32 %v967_v63, %v966_v60 }
 0x234   :  { %v970_v5 = vadd.f32 %v969_v53, %v968_v2 }
 0x236   :  { %v972_v59 = vadd.f32 %v971_v6, %v970_v5 }
 0x238   :  { %v974_v62 = vadd.f32 %v973_v55, %v972_v59 }
 0x23a   :  { %v975_v52 = vrot.slane %v974_v62, 4 }
 0x23c   :  { %v976_v61 = vadd.f32 %v975_v52, %v974_v62 }
 0x23e   :  { %v977_v10 = vrot.slane %v976_v61, 2 }
 0x240   :  { %v978_v12 = vadd.f32 %v977_v10, %v976_v61 }
 0x242   :  { %v979_v57 = vrot.slane %v978_v12, 1 }
 0x244   :  { %v980_v3 = vadd.f32 %v979_v57, %v978_v12 }
 0x246   :  { %6777 = vrcp.f32 %v980_v3 }
 0x250   :  { %v6778_v17 = vpop.eup %6777 }
 0x251   :  { %v982_v19 = vmul.f32 %v6778_v17, %v980_v3 }
 0x252   :  { %v5938_v20 = vpop.f32.mrb[8].mxu0 }
 0x253   :  { %v983_v18 = vsub.f32 2.0, %v982_v19  ;;  %v7440_v15 = vmul.f32 50.0, %v5938_v20  ;;  %v2304_v9 = vpop.f32.mrb[9].mxu0 }
 0x254   :  { %v7442_v14 = vmul.f32 50.0, %v2304_v9 }
 0x255   :  { %v984_v22 = vmul.f32 %v6778_v17, %v983_v18  ;;  %v2359_v23 = vsel %vm81_vm0, %v7440_v15, -inf }
 0x256   :  { %v2358_v24 = vsel %vm81_vm0, %v7442_v14, -inf  ;;  %v5941_v25 = vpop.f32.mrb[10].mxu0 }
 0x257   :  { %v7449_v27 = vmul.f32 50.0, %v5941_v25  ;;  %v2316_v29 = vpop.f32.mrb[11].mxu0  ;;  %v985_v30 = vmul.f32 %v6762_v39, %v984_v22  ;;  %v986_v11 = vmul.f32 %v6764_v40, %v984_v22  ;;  %v987_v21 = vmul.f32 %v6766_v42, %v984_v22 }
 0x258   :  { %v7451_v31 = vmul.f32 50.0, %v2316_v29  ;;  %v988_v28 = vmul.f32 %v6768_v44, %v984_v22  ;;  %v989_v32 = vmul.f32 %v6770_v50, %v984_v22  ;;  %v990_v37 = vmul.f32 %v6772_v58, %v984_v22 }
 0x259   :  { %v2361_v46 = vsel %vm81_vm0, %v7449_v27, -inf  ;;  %v997_v33 = vand.u32 4294901760, %v985_v30  ;;  %v1000_v34 = vand.u32 4294901760, %v986_v11  ;;  %v1003_v36 = vand.u32 4294901760, %v987_v21 }
 0x25a   :  { %v2360_v38 = vsel %vm81_vm0, %v7451_v31, -inf  ;;  %v5944_v35 = vpop.f32.mrb[12].mxu0  ;;  %v1006_v41 = vand.u32 4294901760, %v988_v28  ;;  %v1009_v43 = vand.u32 4294901760, %v989_v32  ;;  %v1012_v39 = vand.u32 4294901760, %v990_v37 }
 0x25b   :  { %v7457_v40 = vmul.f32 50.0, %v5944_v35  ;;  %v2328_v42 = vpop.f32.mrb[13].mxu0  ;;  %v7459_v47 = vpack.c.bf16 %v1000_v34, %v997_v33  ;;  %v7461_v44 = vsub.f32 %v985_v30, %v997_v33  ;;  %v7463_v49 = vsub.f32 %v986_v11, %v1000_v34 }
 0x25c   :  { %v7465_v50 = vmul.f32 50.0, %v2328_v42  ;;  %v7467_v54 = vpack.c.bf16 %v1006_v41, %v1003_v36  ;;  %v7469_v56 = vsub.f32 %v987_v21, %v1003_v36  ;;  %v7471_v58 = vsub.f32 %v988_v28, %v1006_v41 }
 0x25d   :  { %v2364_v60 = vsel %vm81_vm0, %v7457_v40, -inf  ;;  %6262 = vmatpush3.bf16.msra.mxu1 %v7459_v47  ;;  %v7476_v63 = vpack.c.bf16 %v1012_v39, %v1009_v43  ;;  %v7478_v2 = vsub.f32 %v989_v32, %v1009_v43  ;;  %v7480_v53 = vsub.f32 %v990_v37, %v1012_v39 }
 0x25e   :  { %v2365_v5 = vmax.f32 %v2359_v23, %v2364_v60  ;;  %v2362_v6 = vsel %vm81_vm0, %v7465_v50, -inf  ;;  %v5947_v59 = vpop.f32.mrb[14].mxu0  ;;  %6263 = vmatprep.subr.bf16.mxu1 %v6975_v45  ;;  %v991_v55 = vmul.f32 %v7416_v1, %v984_v22  ;;  %v992_v62 = vmul.f32 %v7419_v51, %v984_v22 }
 0x25f   :  { %v2363_v52 = vmax.f32 %v2358_v24, %v2362_v6  ;;  %v7487_v61 = vmul.f32 50.0, %v5947_v59  ;;  %v2340_v10 = vpop.f32.mrb[15].mxu0  ;;  %v1082_v12 = vand.u32 4294901760, %v7461_v44  ;;  %v1089_v57 = vand.u32 4294901760, %v7463_v49 }
 0x260   :  { %v7491_v4 = vmul.f32 50.0, %v2340_v10  ;;  %v1015_v3 = vand.u32 4294901760, %v991_v55  ;;  %v1018_v17 = vand.u32 4294901760, %v992_v62  ;;  %v1096_v19 = vand.u32 4294901760, %v7469_v56 }
 0x261   :  { %v2370_v20 = vmax.f32 %v2363_v52, %v2365_v5  ;;  %v2368_v1 = vsel %vm81_vm0, %v7487_v61, -inf  ;;  %6265 = vmatpush3.bf16.msra.mxu1 %v7467_v54  ;;  %v1083_v51 = vsub.f32 %v7461_v44, %v1082_v12  ;;  %v1090_v18 = vsub.f32 %v7463_v49, %v1089_v57 }
 0x262   :  { %v2369_v9 = vmax.f32 %v2361_v46, %v2368_v1  ;;  %v2366_v22 = vsel %vm81_vm0, %v7491_v4, -inf  ;;  %6266 = vmatprep.subr.bf16.mxu1 %v6975_v45  ;;  %v7502_v23 = vpack.c.bf16 %v1018_v17, %v1015_v3  ;;  %v7504_v24 = vsub.f32 %v991_v55, %v1015_v3 }
 0x263   :  { %v2367_v25 = vmax.f32 %v2360_v38, %v2366_v22  ;;  %v7506_v29 = vsub.f32 %v992_v62, %v1018_v17  ;;  %v1084_v30 = vand.u32 4294901760, %v1083_v51  ;;  %v1091_v11 = vand.u32 4294901760, %v1090_v18 }
 0x264   :  { %v1097_v21 = vsub.f32 %v7469_v56, %v1096_v19  ;;  %v1103_v28 = vand.u32 4294901760, %v7471_v58  ;;  %v1110_v32 = vand.u32 4294901760, %v7478_v2  ;;  %v1117_v37 = vand.u32 4294901760, %v7480_v53 }
 0x265   :  { %v2371_v46 = vmax.f32 %v2367_v25, %v2369_v9  ;;  %6268 = vmatpush3.bf16.msra.mxu1 %v7476_v63  ;;  %v6273_v33 = vpack.c.bf16 %v1091_v11, %v1084_v30  ;;  %v1124_v34 = vand.u32 4294901760, %v7504_v24  ;;  %v1131_v36 = vand.u32 4294901760, %v7506_v29 }
 0x266   :  { %6269 = vmatprep.subr.bf16.mxu1 %v6975_v45  ;;  %v1098_v38 = vand.u32 4294901760, %v1097_v21  ;;  %v1104_v35 = vsub.f32 %v7471_v58, %v1103_v28  ;;  %v1111_v41 = vsub.f32 %v7478_v2, %v1110_v32  ;;  %v1118_v43 = vsub.f32 %v7480_v53, %v1117_v37 }
 0x267   :  { %v2372_v39 = vmax.f32 %v2370_v20, %v2371_v46  ;;  %v1125_v42 = vsub.f32 %v7504_v24, %v1124_v34  ;;  %v1132_v60 = vsub.f32 %v7506_v29, %v1131_v36  ;;  %v6285_v5 = vpack.c.bf16 %v7463_v49, %v7461_v44 }
 0x268   :  { %v1105_v6 = vand.u32 4294901760, %v1104_v35  ;;  %v1112_v59 = vand.u32 4294901760, %v1111_v41  ;;  %v1119_v55 = vand.u32 4294901760, %v1118_v43  ;;  %v6288_v62 = vpack.c.bf16 %v7471_v58, %v7469_v56 }
 0x269   :  { %v2373_v52 = vrot.slane %v2372_v39, 4  ;;  %6271 = vmatpush3.bf16.msra.mxu1 %v7502_v23  ;;  %v1126_v10 = vand.u32 4294901760, %v1125_v42  ;;  %v1133_v3 = vand.u32 4294901760, %v1132_v60  ;;  %v6291_v17 = vpack.c.bf16 %v7480_v53, %v7478_v2 }
 0x26a   :  { %6272 = vmatprep.subr.bf16.mxu1 %v6975_v45  ;;  %v6276_v20 = vpack.c.bf16 %v1105_v6, %v1098_v38  ;;  %v6279_v1 = vpack.c.bf16 %v1119_v55, %v1112_v59  ;;  %v6294_v44 = vpack.c.bf16 %v7506_v29, %v7504_v24  ;;  %v7531_v49 = vpack.c.bf16 %v1089_v57, %v1082_v12 }
 0x26b   :  { %v2374_v51 = vmax.f32 %v2372_v39, %v2373_v52  ;;  %v6282_v18 = vpack.c.bf16 %v1133_v3, %v1126_v10  ;;  %v7533_v56 = vpack.c.bf16 %v1103_v28, %v1096_v19  ;;  %v7535_v58 = vpack.c.bf16 %v1117_v37, %v1110_v32 }
 0x26c   :  { %5767 = vmatmul.mubr.f32.vlgmr.msra.gmra.mrb[8].mxu1 %v1073_v26  ;;  %v7539_v9 = vpack.c.bf16 %v1131_v36, %v1124_v34 }
 0x26d   :  { %v2375_v2 = vrot.slane %v2374_v51, 2  ;;  %6274 = vmatpush3.bf16.msra.mxu1 %v6273_v33  ;;  %5785 = vmatprep.mubr.msk.f32.mxu1 %vm6976_vm2, %v6977_v48 }
 0x26e   :  { %6275 = vmatprep.subr.bf16.mxu1 %v6975_v45 }
 0x26f   :  { %v2376_v53 = vmax.f32 %v2374_v51, %v2375_v2  ;;  %v2436_v51 = vrot.slane %v7425_v13, 1 }
 0x271   :  { %v2377_v12 = vrot.slane %v2376_v53, 1  ;;  %6277 = vmatpush3.bf16.msra.mxu1 %v6276_v20  ;;  %v2437_v2 = vsel %vm81_vm0, %v2436_v51, 0 }
 0x272   :  { %6278 = vmatprep.subr.bf16.mxu1 %v6975_v45 }
 0x273   :  { %v2378_v57 = vmax.f32 %v2376_v53, %v2377_v12  ;;  %v7609_v53 = vand.u32 4294901760, %v2437_v2 }
 0x275   :  { %v2379_v19 = vsub.f32 %v7442_v14, %v2378_v57  ;;  %v2380_v7 = vsub.f32 %v7440_v15, %v2378_v57  ;;  %v2381_v26 = vsub.f32 %v7451_v31, %v2378_v57  ;;  %v2382_v22 = vsub.f32 %v7449_v27, %v2378_v57  ;;  %6280 = vmatpush3.bf16.msra.mxu1 %v6279_v1 }
 0x276   :  { %v2383_v25 = vsub.f32 %v7465_v50, %v2378_v57  ;;  %v2384_v30 = vsub.f32 %v7457_v40, %v2378_v57  ;;  %v2385_v11 = vsub.f32 %v7491_v4, %v2378_v57  ;;  %v2386_v21 = vsub.f32 %v7487_v61, %v2378_v57  ;;  %6281 = vmatprep.subr.bf16.mxu1 %v6975_v45 }
 0x277   :  { %v2387_v28 = vmul.f32 1.442695, %v2379_v19  ;;  %v2389_v32 = vmul.f32 1.442695, %v2380_v7  ;;  %v2391_v14 = vmul.f32 1.442695, %v2381_v26 }
 0x278   :  { %v2393_v37 = vmul.f32 1.442695, %v2382_v22  ;;  %v2395_v15 = vmul.f32 1.442695, %v2383_v25  ;;  %v2397_v27 = vmul.f32 1.442695, %v2384_v30 }
 0x279   :  { %6779 = vpow2.f32 %v2387_v28  ;;  %6283 = vmatpush3.bf16.msra.mxu1 %v6282_v18  ;;  %v2399_v31 = vmul.f32 1.442695, %v2385_v11  ;;  %v2401_v40 = vmul.f32 1.442695, %v2386_v21 }
 0x27a   :  { %6781 = vpow2.f32 %v2389_v32  ;;  %6284 = vmatprep.subr.bf16.mxu1 %v6975_v45 }
 0x27b   :  { %6783 = vpow2.f32 %v2391_v14 }
 0x27c   :  { %6785 = vpow2.f32 %v2393_v37  ;;  %5786 = vmatmul.mubr.f32.vlgmr.msra.gmra.mrb[8].mxu1 %v7429_v8 }
 0x27d   :  { %6286 = vmatpush3.bf16.msra.mxu1 %v6285_v5  ;;  %5804 = vmatprep.mubr.msk.f32.mxu1 %vm6976_vm2, %v6977_v48  ;;  %6787 = vpow2.f32 %v2395_v15 }
 0x27e   :  { %6287 = vmatprep.subr.bf16.mxu1 %v6975_v45  ;;  %6789 = vpow2.f32 %v2397_v27 }
 0x27f   :  { %6791 = vpow2.f32 %v2399_v31 }
 0x280   :  { %6793 = vpow2.f32 %v2401_v40 }
 0x281   :  { %6289 = vmatpush3.bf16.msra.mxu1 %v6288_v62 }
 0x282   :  { %6290 = vmatprep.subr.bf16.mxu1 %v6975_v45 }
 0x283   :  { %v7560_v50 = vpop.eup %6779 }
 0x284   :  { %v7562_v61 = vpop.eup %6781  ;;  %v2403_v4 = vsel %vm81_vm0, %v7560_v50, 0.0 }
 0x285   :  { %v7566_v46 = vpop.eup %6783  ;;  %v2404_v33 = vsel %vm81_vm0, %v7562_v61, 0.0  ;;  %6292 = vmatpush3.bf16.msra.mxu1 %v6291_v17 }
 0x286   :  { %v7570_v34 = vpop.eup %6785  ;;  %v2405_v36 = vadd.f32 %v2404_v33, %v2403_v4  ;;  %6293 = vmatprep.subr.bf16.mxu1 %v6975_v45  ;;  %v2406_v38 = vsel %vm81_vm0, %v7566_v46, 0.0 }
 0x287   :  { %v7575_v35 = vpop.eup %6787  ;;  %v2408_v43 = vsel %vm81_vm0, %v7570_v34, 0.0 }
 0x288   :  { %v2407_v41 = vadd.f32 %v2406_v38, %v2405_v36  ;;  %v6790_v39 = vpop.eup %6789  ;;  %v2410_v60 = vsel %vm81_vm0, %v7575_v35, 0.0 }
 0x289   :  { %6295 = vmatpush3.bf16.msra.mxu1 %v6294_v44  ;;  %v6792_v5 = vpop.eup %6791  ;;  %v2412_v59 = vsel %vm81_vm0, %v6790_v39, 0.0 }
 0x28a   :  { %v2409_v42 = vadd.f32 %v2408_v43, %v2407_v41  ;;  %6296 = vmatprep.subr.bf16.mxu1 %v6975_v45  ;;  %v6794_v24 = vpop.eup %6793  ;;  %v2414_v55 = vsel %vm81_vm0, %v6792_v5, 0.0 }
 0x28b   :  { %v2416_v52 = vsel %vm81_vm0, %v6794_v24, 0.0 }
 0x28c   :  { %v2411_v6 = vadd.f32 %v2410_v60, %v2409_v42  ;;  %5805 = vmatmul.mubr.f32.vlgmr.msra.gmra.mrb[8].mxu1 %v7432_v0  ;;  %v7614_v0 = vsub.f32 %v2437_v2, %v7609_v53 }
 0x28d   :  { %6298 = vmatpush3.bf16.msra.mxu1 %v7459_v47  ;;  %5823 = vmatprep.mubr.msk.f32.mxu1 %vm6976_vm2, %v6977_v48 }
 0x28e   :  { %v2413_v29 = vadd.f32 %v2412_v59, %v2411_v6  ;;  %6299 = vmatprep.subr.bf16.mxu1 %v6975_v45 }
 0x290   :  { %v2415_v62 = vadd.f32 %v2414_v55, %v2413_v29 }
 0x291   :  { %6301 = vmatpush3.bf16.msra.mxu1 %v7467_v54 }
 0x292   :  { %v2417_v10 = vadd.f32 %v2416_v52, %v2415_v62  ;;  %6302 = vmatprep.subr.bf16.mxu1 %v6975_v45 }
 0x294   :  { %v2418_v3 = vrot.slane %v2417_v10, 4 }
 0x295   :  { %6304 = vmatpush3.bf16.msra.mxu1 %v7476_v63 }
 0x296   :  { %v2419_v17 = vadd.f32 %v2418_v3, %v2417_v10  ;;  %6305 = vmatprep.subr.bf16.mxu1 %v6975_v45 }
 0x298   :  { %v2420_v20 = vrot.slane %v2419_v17, 2 }
 0x299   :  { %6307 = vmatpush3.bf16.msra.mxu1 %v7502_v23 }
 0x29a   :  { %v2421_v1 = vadd.f32 %v2420_v20, %v2419_v17  ;;  %6308 = vmatprep.subr.bf16.mxu1 %v6975_v45 }
 0x29c   :  { %v2422_v44 = vrot.slane %v2421_v1, 1  ;;  %5824 = vmatmul.mubr.f32.vlgmr.msra.gmra.mrb[8].mxu1 %v1071_v16 }
 0x29d   :  { %6310 = vmatpush3.bf16.msra.mxu1 %v7531_v49  ;;  %5842 = vmatprep.mubr.msk.f32.mxu1 %vm6976_vm2, %v6977_v48 }
 0x29e   :  { %v2423_v18 = vadd.f32 %v2422_v44, %v2421_v1  ;;  %6311 = vmatprep.subr.bf16.mxu1 %v6975_v45 }
 0x2a0   :  { %6795 = vrcp.f32 %v2423_v18 }
 0x2a1   :  { %6313 = vmatpush3.bf16.msra.mxu1 %v7533_v56  ;;  %v2514_v56 = vand.u32 4294901760, %v7614_v0 }
 0x2a2   :  { %6314 = vmatprep.subr.bf16.mxu1 %v6975_v45 }
 0x2a5   :  { %6316 = vmatpush3.bf16.msra.mxu1 %v7535_v58 }
 0x2a6   :  { %6317 = vmatprep.subr.bf16.mxu1 %v6975_v45 }
 0x2a9   :  { %6319 = vmatpush3.bf16.msra.mxu1 %v7539_v9  ;;  %v7627_v9 = vsub.f32 %v7614_v0, %v2514_v56 }
 0x2aa   :  { %v6796_v16 = vpop.eup %6795  ;;  %6320 = vmatprep.subr.bf16.mxu1 %v6975_v45 }
 0x2ab   :  { %v2425_v49 = vmul.f32 %v6796_v16, %v2423_v18 }
 0x2ac   :  { %5843 = vmatmul.mubr.f32.vlgmr.msra.gmra.mrb[8].mxu1 %v7429_v8 }
 0x2ad   :  { %v2426_v12 = vsub.f32 2.0, %v2425_v49  ;;  %6322 = vmatpush3.bf16.msra.mxu1 %v7459_v47  ;;  %5861 = vmatprep.mubr.msk.f32.mxu1 %vm6976_vm2, %v6977_v48 }
 0x2ae   :  { %6323 = vmatprep.subr.bf16.mxu1 %v6975_v45 }
 0x2af   :  { %v2427_v58 = vmul.f32 %v6796_v16, %v2426_v12 }
 0x2b1   :  { %6325 = vmatpush3.bf16.msra.mxu1 %v7467_v54  ;;  %v2428_v57 = vmul.f32 %v7560_v50, %v2427_v58  ;;  %v2429_v19 = vmul.f32 %v7562_v61, %v2427_v58  ;;  %v2430_v7 = vmul.f32 %v7566_v46, %v2427_v58  ;;  %v2431_v47 = vmul.f32 %v7570_v34, %v2427_v58 }
 0x2b2   :  { %v6136_v26 = vpop.f32.mrb[16].mxu0  ;;  %6326 = vmatprep.subr.bf16.mxu1 %v6975_v45  ;;  %v2432_v22 = vmul.f32 %v7575_v35, %v2427_v58  ;;  %v2433_v25 = vmul.f32 %v6790_v39, %v2427_v58  ;;  %v2434_v30 = vmul.f32 %v6792_v5, %v2427_v58  ;;  %v2435_v11 = vmul.f32 %v6794_v24, %v2427_v58 }
 0x2b3   :  { %v7636_v21 = vmul.f32 50.0, %v6136_v26  ;;  %v3746_v28 = vpop.f32.mrb[17].mxu0  ;;  %v2440_v54 = vand.u32 4294901760, %v2428_v57  ;;  %v2443_v32 = vand.u32 4294901760, %v2429_v19  ;;  %v2446_v14 = vand.u32 4294901760, %v2430_v7 }
 0x2b4   :  { %v7638_v37 = vmul.f32 50.0, %v3746_v28  ;;  %v2449_v15 = vand.u32 4294901760, %v2431_v47  ;;  %v2452_v27 = vand.u32 4294901760, %v2432_v22  ;;  %v2455_v31 = vand.u32 4294901760, %v2433_v25 }
 0x2b5   :  { %v7642_v40 = vsel %vm81_vm0, %v7636_v21, -inf  ;;  %6328 = vmatpush3.bf16.msra.mxu1 %v7476_v63  ;;  %v7645_v50 = vpack.c.bf16 %v2443_v32, %v2440_v54  ;;  %v7647_v61 = vsub.f32 %v2428_v57, %v2440_v54  ;;  %v7649_v4 = vsub.f32 %v2429_v19, %v2443_v32 }
 0x2b6   :  { %v3800_v46 = vsel %vm81_vm0, %v7638_v37, -inf  ;;  %v6139_v33 = vpop.f32.mrb[18].mxu0  ;;  %6329 = vmatprep.subr.bf16.mxu1 %v6975_v45  ;;  %v7654_v34 = vpack.c.bf16 %v2449_v15, %v2446_v14  ;;  %v7656_v36 = vsub.f32 %v2430_v7, %v2446_v14  ;;  %v7658_v38 = vsub.f32 %v2431_v47, %v2449_v15 }
 0x2b7   :  { %v7660_v35 = vmul.f32 50.0, %v6139_v33  ;;  %v3758_v63 = vpop.f32.mrb[19].mxu0  ;;  %v7662_v41 = vpack.c.bf16 %v2455_v31, %v2452_v27  ;;  %v7664_v43 = vsub.f32 %v2432_v22, %v2452_v27  ;;  %v7666_v39 = vsub.f32 %v2433_v25, %v2455_v31 }
 0x2b8   :  { %v7668_v42 = vmul.f32 50.0, %v3758_v63  ;;  %v2458_v60 = vand.u32 4294901760, %v2434_v30  ;;  %v2461_v5 = vand.u32 4294901760, %v2435_v11  ;;  %v2525_v6 = vand.u32 4294901760, %v7647_v61 }
 0x2b9   :  { %v3803_v59 = vsel %vm81_vm0, %v7660_v35, -inf  ;;  %6331 = vmatpush3.bf16.msra.mxu1 %v7502_v23  ;;  %v2532_v24 = vand.u32 4294901760, %v7649_v4  ;;  %v2539_v29 = vand.u32 4294901760, %v7656_v36  ;;  %v2546_v55 = vand.u32 4294901760, %v7658_v38 }
 0x2ba   :  { %v3802_v62 = vsel %vm81_vm0, %v7668_v42, -inf  ;;  %v6142_v52 = vpop.f32.mrb[20].mxu0  ;;  %6332 = vmatprep.subr.bf16.mxu1 %v6975_v45  ;;  %v7680_v10 = vpack.c.bf16 %v2461_v5, %v2458_v60  ;;  %v7682_v3 = vsub.f32 %v2434_v30, %v2458_v60  ;;  %v7684_v17 = vsub.f32 %v2435_v11, %v2461_v5 }
 0x2bb   :  { %v7686_v20 = vmul.f32 50.0, %v6142_v52  ;;  %v3770_v23 = vpop.f32.mrb[21].mxu0  ;;  %v2526_v1 = vsub.f32 %v7647_v61, %v2525_v6  ;;  %v2533_v44 = vsub.f32 %v7649_v4, %v2532_v24  ;;  %v2540_v51 = vsub.f32 %v7656_v36, %v2539_v29 }
 0x2bc   :  { %5862 = vmatmul.mubr.f32.vlgmr.msra.gmra.mrb[8].mxu1 %v7429_v8  ;;  %v7692_v18 = vmul.f32 50.0, %v3770_v23  ;;  %v2547_v2 = vsub.f32 %v7658_v38, %v2546_v55  ;;  %v2553_v16 = vand.u32 4294901760, %v7664_v43  ;;  %v2560_v49 = vand.u32 4294901760, %v7666_v39 }
 0x2bd   :  { %v3806_v12 = vsel %vm81_vm0, %v7686_v20, -inf  ;;  %6334 = vmatpush3.bf16.msra.mxu1 %v7645_v50  ;;  %5964 = vmatprep.mubr.msk.f32.mxu1 %vm6976_vm2, %v6977_v48  ;;  %v2527_v58 = vand.u32 4294901760, %v2526_v1  ;;  %v2534_v57 = vand.u32 4294901760, %v2533_v44  ;;  %v2541_v19 = vand.u32 4294901760, %v2540_v51 }
 0x2be   :  { %v3807_v8 = vmax.f32 %v7642_v40, %v3806_v12  ;;  %v3804_v7 = vsel %vm81_vm0, %v7692_v18, -inf  ;;  %v6145_v47 = vpop.f32.mrb[22].mxu0  ;;  %6335 = vmatprep.subr.bf16.mxu1 %v6975_v45  ;;  %v2548_v26 = vand.u32 4294901760, %v2547_v2  ;;  %v2554_v22 = vsub.f32 %v7664_v43, %v2553_v16 }
 0x2bf   :  { %v3805_v25 = vmax.f32 %v3800_v46, %v3804_v7  ;;  %v7707_v30 = vmul.f32 50.0, %v6145_v47  ;;  %v3782_v11 = vpop.f32.mrb[23].mxu0  ;;  %v6345_v28 = vpack.c.bf16 %v2534_v57, %v2527_v58  ;;  %v2561_v54 = vsub.f32 %v7666_v39, %v2560_v49 }
 0x2c0   :  { %v7710_v32 = vmul.f32 50.0, %v3782_v11  ;;  %v6348_v14 = vpack.c.bf16 %v2548_v26, %v2541_v19  ;;  %v2555_v15 = vand.u32 4294901760, %v2554_v22  ;;  %v2567_v27 = vand.u32 4294901760, %v7682_v3 }
 0x2c1   :  { %v3812_v31 = vmax.f32 %v3805_v25, %v3807_v8  ;;  %v3810_v40 = vsel %vm81_vm0, %v7707_v30, -inf  ;;  %6337 = vmatpush3.bf16.msra.mxu1 %v7654_v34  ;;  %v2562_v33 = vand.u32 4294901760, %v2561_v54  ;;  %v2574_v46 = vand.u32 4294901760, %v7684_v17 }
 0x2c2   :  { %v3811_v63 = vmax.f32 %v3803_v59, %v3810_v40  ;;  %v3808_v60 = vsel %vm81_vm0, %v7710_v32, -inf  ;;  %6338 = vmatprep.subr.bf16.mxu1 %v6975_v45  ;;  %v2568_v5 = vsub.f32 %v7682_v3, %v2567_v27  ;;  %v6357_v52 = vpack.c.bf16 %v7649_v4, %v7647_v61 }
 0x2c3   :  { %v3809_v23 = vmax.f32 %v3802_v62, %v3808_v60  ;;  %v6351_v1 = vpack.c.bf16 %v2562_v33, %v2555_v15  ;;  %v2575_v44 = vsub.f32 %v7684_v17, %v2574_v46  ;;  %v6360_v51 = vpack.c.bf16 %v7658_v38, %v7656_v36 }
 0x2c4   :  { %v2569_v2 = vand.u32 4294901760, %v2568_v5  ;;  %v6363_v59 = vpack.c.bf16 %v7666_v39, %v7664_v43  ;;  %v6366_v12 = vpack.c.bf16 %v7684_v17, %v7682_v3  ;;  %v7730_v58 = vpack.c.bf16 %v2532_v24, %v2525_v6 }
 0x2c5   :  { %v3813_v57 = vmax.f32 %v3809_v23, %v3811_v63  ;;  %6340 = vmatpush3.bf16.msra.mxu1 %v7662_v41  ;;  %v2576_v61 = vand.u32 4294901760, %v2575_v44  ;;  %v7733_v4 = vpack.c.bf16 %v2546_v55, %v2539_v29  ;;  %v7735_v62 = vpack.c.bf16 %v2560_v49, %v2553_v16 }
 0x2c6   :  { %6341 = vmatprep.subr.bf16.mxu1 %v6975_v45  ;;  %v7738_v36 = vpack.c.bf16 %v2574_v46, %v2567_v27  ;;  %v2516_v8 = vand.u32 4294901760, %v7627_v9 }
 0x2c7   :  { %v3814_v38 = vmax.f32 %v3812_v31, %v3813_v57  ;;  %v6354_v19 = vpack.c.bf16 %v2576_v61, %v2569_v2 }
 0x2c9   :  { %v3815_v7 = vrot.slane %v3814_v38, 4  ;;  %6343 = vmatpush3.bf16.msra.mxu1 %v7680_v10 }
 0x2ca   :  { %6344 = vmatprep.subr.bf16.mxu1 %v6975_v45 }
 0x2cb   :  { %v3816_v6 = vmax.f32 %v3814_v38, %v3815_v7 }
 0x2cc   :  { %5965 = vmatmul.mubr.f32.vlgmr.msra.gmra.mrb[10].mxu1 %v2516_v8 }
 0x2cd   :  { %v3817_v24 = vrot.slane %v3816_v6, 2  ;;  %6346 = vmatpush3.bf16.msra.mxu1 %v6345_v28  ;;  %5983 = vmatprep.mubr.msk.f32.mxu1 %vm6976_vm2, %v6977_v48 }
 0x2ce   :  { %6347 = vmatprep.subr.bf16.mxu1 %v6975_v45 }
 0x2cf   :  { %v3818_v29 = vmax.f32 %v3816_v6, %v3817_v24  ;;  %v3878_v6 = vrot.slane %v7425_v13, 2 }
 0x2d1   :  { %v3819_v55 = vrot.slane %v3818_v29, 1  ;;  %6349 = vmatpush3.bf16.msra.mxu1 %v6348_v14 }
 0x2d2   :  { %6350 = vmatprep.subr.bf16.mxu1 %v6975_v45 }
 0x2d3   :  { %v3820_v9 = vmax.f32 %v3818_v29, %v3819_v55 }
 0x2d5   :  { %v3821_v16 = vsub.f32 %v7638_v37, %v3820_v9  ;;  %v3822_v49 = vsub.f32 %v7636_v21, %v3820_v9  ;;  %v3823_v47 = vsub.f32 %v7668_v42, %v3820_v9  ;;  %v3824_v26 = vsub.f32 %v7660_v35, %v3820_v9  ;;  %6352 = vmatpush3.bf16.msra.mxu1 %v6351_v1 }
 0x2d6   :  { %v3825_v22 = vsub.f32 %v7692_v18, %v3820_v9  ;;  %v3826_v25 = vsub.f32 %v7686_v20, %v3820_v9  ;;  %v3827_v11 = vsub.f32 %v7710_v32, %v3820_v9  ;;  %v3828_v28 = vsub.f32 %v7707_v30, %v3820_v9  ;;  %6353 = vmatprep.subr.bf16.mxu1 %v6975_v45 }
 0x2d7   :  { %v3829_v54 = vmul.f32 1.442695, %v3821_v16  ;;  %v3831_v14 = vmul.f32 1.442695, %v3822_v49  ;;  %v3833_v37 = vmul.f32 1.442695, %v3823_v47 }
 0x2d8   :  { %v3835_v15 = vmul.f32 1.442695, %v3824_v26  ;;  %v3837_v21 = vmul.f32 1.442695, %v3825_v22  ;;  %v3839_v35 = vmul.f32 1.442695, %v3826_v25 }
 0x2d9   :  { %6797 = vpow2.f32 %v3829_v54  ;;  %6355 = vmatpush3.bf16.msra.mxu1 %v6354_v19  ;;  %v3841_v42 = vmul.f32 1.442695, %v3827_v11  ;;  %v3843_v20 = vmul.f32 1.442695, %v3828_v28 }
 0x2da   :  { %6799 = vpow2.f32 %v3831_v14  ;;  %6356 = vmatprep.subr.bf16.mxu1 %v6975_v45 }
 0x2db   :  { %6801 = vpow2.f32 %v3833_v37 }
 0x2dc   :  { %6803 = vpow2.f32 %v3835_v15  ;;  %5984 = vmatmul.mubr.f32.vlgmr.msra.gmra.mrb[10].mxu1 %v7609_v53 }
 0x2dd   :  { %6358 = vmatpush3.bf16.msra.mxu1 %v6357_v52  ;;  %6002 = vmatprep.mubr.msk.f32.mxu1 %vm6976_vm2, %v6977_v48  ;;  %6805 = vpow2.f32 %v3837_v21 }
 0x2de   :  { %6359 = vmatprep.subr.bf16.mxu1 %v6975_v45  ;;  %6807 = vpow2.f32 %v3839_v35 }
 0x2df   :  { %6809 = vpow2.f32 %v3841_v42 }
 0x2e0   :  { %6811 = vpow2.f32 %v3843_v20 }
 0x2e1   :  { %6361 = vmatpush3.bf16.msra.mxu1 %v6360_v51 }
 0x2e2   :  { %6362 = vmatprep.subr.bf16.mxu1 %v6975_v45 }
 0x2e3   :  { %v7762_v18 = vpop.eup %6797 }
 0x2e4   :  { %v7764_v30 = vpop.eup %6799  ;;  %v3845_v32 = vsel %vm81_vm0, %v7762_v18, 0.0 }
 0x2e5   :  { %v7768_v27 = vpop.eup %6801  ;;  %v3846_v31 = vsel %vm81_vm0, %v7764_v30, 0.0  ;;  %6364 = vmatpush3.bf16.msra.mxu1 %v6363_v59 }
 0x2e6   :  { %v7775_v40 = vpop.eup %6803  ;;  %v3847_v33 = vadd.f32 %v3846_v31, %v3845_v32  ;;  %6365 = vmatprep.subr.bf16.mxu1 %v6975_v45  ;;  %v3848_v46 = vsel %vm81_vm0, %v7768_v27, 0.0 }
 0x2e7   :  { %v7780_v63 = vpop.eup %6805  ;;  %v3850_v5 = vsel %vm81_vm0, %v7775_v40, 0.0 }
 0x2e8   :  { %v3849_v60 = vadd.f32 %v3848_v46, %v3847_v33  ;;  %v6808_v43 = vpop.eup %6807  ;;  %v3852_v52 = vsel %vm81_vm0, %v7780_v63, 0.0 }
 0x2e9   :  { %6367 = vmatpush3.bf16.msra.mxu1 %v6366_v12  ;;  %v6810_v23 = vpop.eup %6809  ;;  %v3854_v44 = vsel %vm81_vm0, %v6808_v43, 0.0 }
 0x2ea   :  { %v3851_v39 = vadd.f32 %v3850_v5, %v3849_v60  ;;  %6368 = vmatprep.subr.bf16.mxu1 %v6975_v45  ;;  %v6812_v3 = vpop.eup %6811  ;;  %v3856_v51 = vsel %vm81_vm0, %v6810_v23, 0.0 }
 0x2eb   :  { %v3858_v59 = vsel %vm81_vm0, %v6812_v3, 0.0 }
 0x2ec   :  { %v3853_v1 = vadd.f32 %v3852_v52, %v3851_v39  ;;  %6003 = vmatmul.mubr.f32.vlgmr.msra.gmra.mrb[10].mxu1 %v7614_v0  ;;  %v3879_v0 = vsel %vm81_vm0, %v3878_v6, 0 }
 0x2ed   :  { %6370 = vmatpush3.bf16.msra.mxu1 %v7645_v50  ;;  %6021 = vmatprep.mubr.msk.f32.mxu1 %vm6976_vm2, %v6977_v48 }
 0x2ee   :  { %v3855_v17 = vadd.f32 %v3854_v44, %v3853_v1  ;;  %6371 = vmatprep.subr.bf16.mxu1 %v6975_v45 }
 0x2f0   :  { %v3857_v2 = vadd.f32 %v3856_v51, %v3855_v17 }
 0x2f1   :  { %6373 = vmatpush3.bf16.msra.mxu1 %v7654_v34 }
 0x2f2   :  { %v3859_v12 = vadd.f32 %v3858_v59, %v3857_v2  ;;  %6374 = vmatprep.subr.bf16.mxu1 %v6975_v45 }
 0x2f4   :  { %v3860_v57 = vrot.slane %v3859_v12, 4 }
 0x2f5   :  { %6376 = vmatpush3.bf16.msra.mxu1 %v7662_v41 }
 0x2f6   :  { %v3861_v61 = vadd.f32 %v3860_v57, %v3859_v12  ;;  %6377 = vmatprep.subr.bf16.mxu1 %v6975_v45 }
 0x2f8   :  { %v3862_v38 = vrot.slane %v3861_v61, 2 }
 0x2f9   :  { %6379 = vmatpush3.bf16.msra.mxu1 %v7680_v10 }
 0x2fa   :  { %v3863_v19 = vadd.f32 %v3862_v38, %v3861_v61  ;;  %6380 = vmatprep.subr.bf16.mxu1 %v6975_v45 }
 0x2fc   :  { %v3864_v8 = vrot.slane %v3863_v19, 1  ;;  %6022 = vmatmul.mubr.f32.vlgmr.msra.gmra.mrb[10].mxu1 %v2514_v56  ;;  %v7816_v56 = vand.u32 4294901760, %v3879_v0 }
 0x2fd   :  { %6382 = vmatpush3.bf16.msra.mxu1 %v7730_v58  ;;  %6040 = vmatprep.mubr.msk.f32.mxu1 %vm6976_vm2, %v6977_v48 }
 0x2fe   :  { %v3865_v7 = vadd.f32 %v3864_v8, %v3863_v19  ;;  %6383 = vmatprep.subr.bf16.mxu1 %v6975_v45  ;;  %v7822_v13 = vsub.f32 %v3879_v0, %v7816_v56 }
 0x300   :  { %6813 = vrcp.f32 %v3865_v7 }
 0x301   :  { %6385 = vmatpush3.bf16.msra.mxu1 %v7733_v4 }
 0x302   :  { %6386 = vmatprep.subr.bf16.mxu1 %v6975_v45 }
 0x305   :  { %6388 = vmatpush3.bf16.msra.mxu1 %v7735_v62 }
 0x306   :  { %6389 = vmatprep.subr.bf16.mxu1 %v6975_v45 }
 0x309   :  { %6391 = vmatpush3.bf16.msra.mxu1 %v7738_v36  ;;  %v3956_v36 = vand.u32 4294901760, %v7822_v13 }
 0x30a   :  { %v6814_v58 = vpop.eup %6813  ;;  %6392 = vmatprep.subr.bf16.mxu1 %v6975_v45 }
 0x30b   :  { %v3867_v24 = vmul.f32 %v6814_v58, %v3865_v7 }
 0x30c   :  { %6041 = vmatmul.mubr.f32.vlgmr.msra.gmra.mrb[10].mxu1 %v7609_v53 }
 0x30d   :  { %v3868_v4 = vsub.f32 2.0, %v3867_v24  ;;  %6394 = vmatpush3.bf16.msra.mxu1 %v7645_v50  ;;  %6059 = vmatprep.mubr.msk.f32.mxu1 %vm6976_vm2, %v6977_v48 }
 0x30e   :  { %6395 = vmatprep.subr.bf16.mxu1 %v6975_v45 }
 0x30f   :  { %v3869_v62 = vmul.f32 %v6814_v58, %v3868_v4 }
 0x311   :  { %6397 = vmatpush3.bf16.msra.mxu1 %v7654_v34  ;;  %v3870_v29 = vmul.f32 %v7762_v18, %v3869_v62  ;;  %v3871_v55 = vmul.f32 %v7764_v30, %v3869_v62  ;;  %v3872_v9 = vmul.f32 %v7768_v27, %v3869_v62  ;;  %v3873_v16 = vmul.f32 %v7775_v40, %v3869_v62 }
 0x312   :  { %6398 = vmatprep.subr.bf16.mxu1 %v6975_v45  ;;  %v3874_v50 = vmul.f32 %v7780_v63, %v3869_v62  ;;  %v3875_v49 = vmul.f32 %v6808_v43, %v3869_v62  ;;  %v3876_v47 = vmul.f32 %v6810_v23, %v3869_v62  ;;  %v3877_v26 = vmul.f32 %v6812_v3, %v3869_v62 }
 0x313   :  { %v3882_v22 = vand.u32 4294901760, %v3870_v29  ;;  %v3885_v25 = vand.u32 4294901760, %v3871_v55  ;;  %v3888_v11 = vand.u32 4294901760, %v3872_v9  ;;  %v3891_v28 = vand.u32 4294901760, %v3873_v16 }
 0x314   :  { %v3894_v34 = vand.u32 4294901760, %v3874_v50  ;;  %v3897_v54 = vand.u32 4294901760, %v3875_v49  ;;  %v3900_v14 = vand.u32 4294901760, %v3876_v47  ;;  %v3903_v37 = vand.u32 4294901760, %v3877_v26 }
 0x315   :  { %6400 = vmatpush3.bf16.msra.mxu1 %v7662_v41  ;;  %v7837_v15 = vpack.c.bf16 %v3885_v25, %v3882_v22  ;;  %v7839_v21 = vsub.f32 %v3870_v29, %v3882_v22  ;;  %v7841_v35 = vsub.f32 %v3871_v55, %v3885_v25  ;;  %v7843_v42 = vpack.c.bf16 %v3891_v28, %v3888_v11 }
 0x316   :  { %6401 = vmatprep.subr.bf16.mxu1 %v6975_v45  ;;  %v7846_v20 = vsub.f32 %v3872_v9, %v3888_v11  ;;  %v7848_v18 = vsub.f32 %v3873_v16, %v3891_v28  ;;  %v7850_v30 = vpack.c.bf16 %v3897_v54, %v3894_v34  ;;  %v7852_v32 = vsub.f32 %v3874_v50, %v3894_v34 }
 0x317   :  { %v7854_v27 = vsub.f32 %v3875_v49, %v3897_v54  ;;  %v7856_v41 = vpack.c.bf16 %v3903_v37, %v3900_v14  ;;  %v7858_v31 = vsub.f32 %v3876_v47, %v3900_v14  ;;  %v7860_v40 = vsub.f32 %v3877_v26, %v3903_v37 }
 0x318   :  { %v3967_v33 = vand.u32 4294901760, %v7839_v21  ;;  %v3974_v46 = vand.u32 4294901760, %v7841_v35  ;;  %v3981_v63 = vand.u32 4294901760, %v7846_v20  ;;  %v3988_v60 = vand.u32 4294901760, %v7848_v18 }
 0x319   :  { %6403 = vmatpush3.bf16.msra.mxu1 %v7680_v10  ;;  %v3995_v5 = vand.u32 4294901760, %v7852_v32  ;;  %v4002_v43 = vand.u32 4294901760, %v7854_v27  ;;  %v4009_v39 = vand.u32 4294901760, %v7858_v31  ;;  %v4016_v52 = vand.u32 4294901760, %v7860_v40 }
 0x31a   :  { %6404 = vmatprep.subr.bf16.mxu1 %v6975_v45  ;;  %v3968_v23 = vsub.f32 %v7839_v21, %v3967_v33  ;;  %v3975_v1 = vsub.f32 %v7841_v35, %v3974_v46  ;;  %v3982_v44 = vsub.f32 %v7846_v20, %v3981_v63  ;;  %v3989_v3 = vsub.f32 %v7848_v18, %v3988_v60 }
 0x31b   :  { %v3996_v10 = vsub.f32 %v7852_v32, %v3995_v5  ;;  %v4003_v17 = vsub.f32 %v7854_v27, %v4002_v43  ;;  %v4010_v51 = vsub.f32 %v7858_v31, %v4009_v39  ;;  %v4017_v2 = vsub.f32 %v7860_v40, %v4016_v52 }
 0x31c   :  { %6060 = vmatmul.mubr.f32.vlgmr.msra.gmra.mrb[10].mxu1 %v7609_v53  ;;  %v3969_v59 = vand.u32 4294901760, %v3968_v23  ;;  %v3976_v12 = vand.u32 4294901760, %v3975_v1  ;;  %v3983_v57 = vand.u32 4294901760, %v3982_v44  ;;  %v3990_v61 = vand.u32 4294901760, %v3989_v3 }
 0x31d   :  { %6406 = vmatpush3.bf16.msra.mxu1 %v7837_v15  ;;  %6162 = vmatprep.mubr.msk.f32.mxu1 %vm6976_vm2, %v6977_v48  ;;  %v3997_v38 = vand.u32 4294901760, %v3996_v10  ;;  %v4004_v19 = vand.u32 4294901760, %v4003_v17  ;;  %v4011_v8 = vand.u32 4294901760, %v4010_v51  ;;  %v4018_v7 = vand.u32 4294901760, %v4017_v2 }
 0x31e   :  { %6407 = vmatprep.subr.bf16.mxu1 %v6975_v45  ;;  %v6417_v6 = vpack.c.bf16 %v3976_v12, %v3969_v59  ;;  %v6420_v0 = vpack.c.bf16 %v3990_v61, %v3983_v57  ;;  %v6429_v53 = vpack.c.bf16 %v7841_v35, %v7839_v21  ;;  %v6432_v58 = vpack.c.bf16 %v7848_v18, %v7846_v20 }
 0x31f   :  { %v6423_v24 = vpack.c.bf16 %v4004_v19, %v3997_v38  ;;  %v6426_v4 = vpack.c.bf16 %v4018_v7, %v4011_v8  ;;  %v6435_v62 = vpack.c.bf16 %v7854_v27, %v7852_v32  ;;  %v6438_v29 = vpack.c.bf16 %v7860_v40, %v7858_v31 }
 0x320   :  { %v6453_v55 = vpack.c.bf16 %v3974_v46, %v3967_v33  ;;  %v6456_v9 = vpack.c.bf16 %v3988_v60, %v3981_v63  ;;  %v6459_v16 = vpack.c.bf16 %v4002_v43, %v3995_v5  ;;  %v6462_v50 = vpack.c.bf16 %v4016_v52, %v4009_v39 }
 0x321   :  { %6409 = vmatpush3.bf16.msra.mxu1 %v7843_v42  ;;  %v3957_v49 = vsub.f32 %v7822_v13, %v3956_v36 }
 0x322   :  { %6410 = vmatprep.subr.bf16.mxu1 %v6975_v45 }
 0x323   :  { %v3958_v47 = vand.u32 4294901760, %v3957_v49 }
 0x325   :  { %6412 = vmatpush3.bf16.msra.mxu1 %v7850_v30 }
 0x326   :  { %6413 = vmatprep.subr.bf16.mxu1 %v6975_v45 }
 0x329   :  { %6415 = vmatpush3.bf16.msra.mxu1 %v7856_v41 }
 0x32a   :  { %6416 = vmatprep.subr.bf16.mxu1 %v6975_v45 }
 0x32c   :  { %6163 = vmatmul.mubr.f32.vlgmr.msra.gmra.mrb[12].mxu1 %v3958_v47 }
 0x32d   :  { %6418 = vmatpush3.bf16.msra.mxu1 %v6417_v6  ;;  %6181 = vmatprep.mubr.msk.f32.mxu1 %vm6976_vm2, %v6977_v48 }
 0x32e   :  { %6419 = vmatprep.subr.bf16.mxu1 %v6975_v45 }
 0x331   :  { %6421 = vmatpush3.bf16.msra.mxu1 %v6420_v0 }
 0x332   :  { %6422 = vmatprep.subr.bf16.mxu1 %v6975_v45 }
 0x335   :  { %6424 = vmatpush3.bf16.msra.mxu1 %v6423_v24 }
 0x336   :  { %6425 = vmatprep.subr.bf16.mxu1 %v6975_v45 }
 0x339   :  { %6427 = vmatpush3.bf16.msra.mxu1 %v6426_v4 }
 0x33a   :  { %6428 = vmatprep.subr.bf16.mxu1 %v6975_v45 }
 0x33c   :  { %6182 = vmatmul.mubr.f32.vlgmr.msra.gmra.mrb[12].mxu1 %v7816_v56 }
 0x33d   :  { %6430 = vmatpush3.bf16.msra.mxu1 %v6429_v53  ;;  %6200 = vmatprep.mubr.msk.f32.mxu1 %vm6976_vm2, %v6977_v48 }
 0x33e   :  { %6431 = vmatprep.subr.bf16.mxu1 %v6975_v45 }
 0x341   :  { %6433 = vmatpush3.bf16.msra.mxu1 %v6432_v58 }
 0x342   :  { %6434 = vmatprep.subr.bf16.mxu1 %v6975_v45 }
 0x345   :  { %6436 = vmatpush3.bf16.msra.mxu1 %v6435_v62 }
 0x346   :  { %6437 = vmatprep.subr.bf16.mxu1 %v6975_v45 }
 0x349   :  { %6439 = vmatpush3.bf16.msra.mxu1 %v6438_v29 }
 0x34a   :  { %6440 = vmatprep.subr.bf16.mxu1 %v6975_v45 }
 0x34c   :  { %6201 = vmatmul.mubr.f32.vlgmr.msra.gmra.mrb[12].mxu1 %v7822_v13 }
 0x34d   :  { %6442 = vmatpush3.bf16.msra.mxu1 %v7837_v15  ;;  %6219 = vmatprep.mubr.msk.f32.mxu1 %vm6976_vm2, %v6977_v48 }
 0x34e   :  { %6443 = vmatprep.subr.bf16.mxu1 %v6975_v45 }
 0x351   :  { %6445 = vmatpush3.bf16.msra.mxu1 %v7843_v42 }
 0x352   :  { %6446 = vmatprep.subr.bf16.mxu1 %v6975_v45 }
 0x355   :  { %6448 = vmatpush3.bf16.msra.mxu1 %v7850_v30 }
 0x356   :  { %6449 = vmatprep.subr.bf16.mxu1 %v6975_v45 }
 0x359   :  { %6451 = vmatpush3.bf16.msra.mxu1 %v7856_v41 }
 0x35a   :  { %6452 = vmatprep.subr.bf16.mxu1 %v6975_v45 }
 0x35c   :  { %6220 = vmatmul.mubr.f32.vlgmr.msra.gmra.mrb[12].mxu1 %v3956_v36 }
 0x35d   :  { %6454 = vmatpush3.bf16.msra.mxu1 %v6453_v55  ;;  %6238 = vmatprep.mubr.msk.f32.mxu1 %vm6976_vm2, %v6977_v48 }
 0x35e   :  { %6455 = vmatprep.subr.bf16.mxu1 %v6975_v45 }
 0x361   :  { %6457 = vmatpush3.bf16.msra.mxu1 %v6456_v9 }
 0x362   :  { %6458 = vmatprep.subr.bf16.mxu1 %v6975_v45 }
 0x365   :  { %6460 = vmatpush3.bf16.msra.mxu1 %v6459_v16 }
 0x366   :  { %6461 = vmatprep.subr.bf16.mxu1 %v6975_v45 }
 0x369   :  { %6463 = vmatpush3.bf16.msra.mxu1 %v6462_v50 }
 0x36a   :  { %6464 = vmatprep.subr.bf16.mxu1 %v6975_v45 }
 0x36c   :  { %6239 = vmatmul.mubr.f32.vlgmr.msra.gmra.mrb[12].mxu1 %v7816_v56 }
 0x36d   :  { %6466 = vmatpush3.bf16.msra.mxu1 %v7837_v15  ;;  %6257 = vmatprep.mubr.msk.f32.mxu1 %vm6976_vm2, %v6977_v48 }
 0x36e   :  { %6467 = vmatprep.subr.bf16.mxu1 %v6975_v45 }
 0x371   :  { %6469 = vmatpush3.bf16.msra.mxu1 %v7843_v42 }
 0x372   :  { %6470 = vmatprep.subr.bf16.mxu1 %v6975_v45 }
 0x375   :  { %6472 = vmatpush3.bf16.msra.mxu1 %v7850_v30 }
 0x376   :  { %6473 = vmatprep.subr.bf16.mxu1 %v6975_v45 }
 0x379   :  { %6475 = vmatpush3.bf16.msra.mxu1 %v7856_v41 }
 0x37c   :  { %6258 = vmatmul.mubr.f32.vlgmr.msra.gmra.mrb[12].mxu1 %v7816_v56 }
 0x38f   :  { %v1529_v13 = vpop.f32.mrb[8].mxu1 }
 0x390   :  { %1534 = vst.msk [vmem:[#allocation2] sm:$0x1] %vm1533_vm3, %v1529_v13  ;;  %v5863_v36 = vpop.f32.mrb[9].mxu1 }
 0x391   :  { %6924 = shalt.err (!%p6921_p6)  }
 0x392   :  { %s6925_s22 = scalar_lea.vmem %s76_s15, 2048  ;;  %p6930_p8 = scmp.lt.s32.totalorder %s76_s15, %s76_s15 }
 0x393   :  { %p6926_p7 = scmp.ne.s32.totalorder %s76_s15, %s6925_s22  ;;  %p6931_p9 = scmp.lt.s32.totalorder %s6925_s22, %s6925_s22 }
 0x395   :  { %p6932_p10 = por %p6931_p9, %p6930_p8 }
 0x397   :  { %p6933_p11 = pnand %p6932_p10, %p6926_p7 }
 0x399   :  { %6936 = shalt.err (!%p6933_p11)  }
 0x39a   :  { %78 = dma.hbm_to_vmem [thread:$0]  %s8240_s4, 2048, %s76_s15, [#allocation4] }
 0x3ef   :  { %v2972_v45 = vpop.f32.mrb[10].mxu1 }
 0x3f0   :  { %2976 = vst.msk [vmem:[#allocation2 + $0x1] sm:$0x1] %vm1533_vm3, %v2972_v45  ;;  %v6061_v56 = vpop.f32.mrb[11].mxu1 }
 0x44f   :  { %v4414_v26 = vpop.f32.mrb[12].mxu1 }
 0x450   :  { %4418 = vst.msk [vmem:[#allocation2 + $0x2] sm:$0x1] %vm1533_vm3, %v4414_v26  ;;  %v6259_v22 = vpop.f32.mrb[13].mxu1 }
 0x451   :  { %6965 = dma.done.wait [#allocation4], 2048 }
 0x452   :  { %6966 = vsyncadd [#allocation4], 4294965248  ;;  %4523 = vmatprep.mubr.f32.mxu0 %v6977_v48  ;;  %v4425_v25 = vld [vmem:[#allocation3 + $0x8] sm:$0xff]  ;;  %v4427_v11 = vld [vmem:[#allocation3 + $0x18] sm:$0xff]  ;;  %vm5158_vm4 = vcmask 1040384   ;;  %vm5090_vm5 = vcmask 1042432  }
 0x453   :  { %v4424_v28 = vld [vmem:[#allocation3] sm:$0xff]  ;;  %v4443_v34 = vand.u32 4294901760, %v4425_v25  ;;  %v4447_v54 = vand.u32 4294901760, %v4427_v11  ;;  %v4426_v14 = vld [vmem:[#allocation3 + $0x10] sm:$0xff]  ;;  %v4429_v15 = vld [vmem:[#allocation3 + $0x28] sm:$0xff]  ;;  %s6981_s0 = smov [#allocation13]  }
 0x454   :  { %v4445_v37 = vand.u32 4294901760, %v4424_v28  ;;  %v4431_v21 = vld [vmem:[#allocation3 + $0x38] sm:$0xff]  ;;  %v4449_v35 = vand.u32 4294901760, %v4426_v14  ;;  %v4451_v42 = vand.u32 4294901760, %v4429_v15  ;;  %v4428_v18 = vld [vmem:[#allocation3 + $0x20] sm:$0xff]  ;;  %v4430_v30 = vld [vmem:[#allocation3 + $0x30] sm:$0xff] }
 0x455   :  { %v4455_v20 = vand.u32 4294901760, %v4431_v21  ;;  %v4433_v32 = vld [vmem:[#allocation3 + $0x48] sm:$0xff]  ;;  %v7961_v27 = vpack.c.bf16 %v4447_v54, %v4443_v34  ;;  %v7963_v41 = vsub.f32 %v4425_v25, %v4443_v34  ;;  %v7965_v31 = vsub.f32 %v4427_v11, %v4447_v54  ;;  %v4435_v33 = vld [vmem:[#allocation3 + $0x58] sm:$0xff]  ;;  %v4432_v46 = vld [vmem:[#allocation3 + $0x40] sm:$0xff]  ;;  %s5324_s28 = sshll.u32 %s6981_s0, 4  ;;  %s5325_s28 = int_to_ptr.vmem [resolvable:$true] %s5324_s28 }
 0x456   :  { %v7967_v40 = vsub.f32 %v4424_v28, %v4445_v37  ;;  %v4434_v63 = vld [vmem:[#allocation3 + $0x50] sm:$0xff]  ;;  %v7969_v60 = vpack.c.bf16 %v4449_v35, %v4445_v37  ;;  %v7971_v5 = vsub.f32 %v4426_v14, %v4449_v35  ;;  %v7975_v39 = vsub.f32 %v4429_v15, %v4451_v42  ;;  %v4437_v52 = vld [vmem:[#allocation3 + $0x68] sm:$0xff]  ;;  %v4439_v2 = vld [vmem:[#allocation3 + $0x78] sm:$0xff]  ;;  %s6937_s29 = scalar_lea.vmem %s5325_s28, 32  ;;  %p6942_p13 = scmp.lt.s32.totalorder %s5325_s28, %s5325_s28 }
 0x457   :  { %v7973_v43 = vpack.c.bf16 %v4455_v20, %v4451_v42  ;;  %6477 = vmatprep.subr.bf16.mxu0 %v7961_v27  ;;  %v7978_v23 = vsub.f32 %v4431_v21, %v4455_v20  ;;  %v4453_v1 = vand.u32 4294901760, %v4428_v18  ;;  %v4457_v44 = vand.u32 4294901760, %v4430_v30  ;;  %v4436_v12 = vld [vmem:[#allocation3 + $0x60] sm:$0xff]  ;;  %v4438_v8 = vld [vmem:[#allocation3 + $0x70] sm:$0xff]  ;;  %v4423_v7 = vld [vmem:[#allocation2] sm:$0x7]  ;;  %p6938_p12 = scmp.ne.s32.totalorder %s5325_s28, %s6937_s29  ;;  %p6943_p0 = scmp.lt.s32.totalorder %s6937_s29, %s6937_s29 }
 0x458   :  { %v4459_v3 = vand.u32 4294901760, %v4433_v32  ;;  %6479 = vmatpush1.bf16.msra.mxu0 %v7969_v60  ;;  %v4463_v10 = vand.u32 4294901760, %v4435_v33  ;;  %v4461_v17 = vand.u32 4294901760, %v4432_v46  ;;  %v4465_v51 = vand.u32 4294901760, %v4434_v63 }
 0x459   :  { %v4467_v59 = vand.u32 4294901760, %v4437_v52  ;;  %6481 = vmatprep.subr.bf16.mxu0 %v7973_v43  ;;  %v7982_v57 = vpack.c.bf16 %v4457_v44, %v4453_v1  ;;  %v7984_v61 = vsub.f32 %v4428_v18, %v4453_v1  ;;  %v7986_v38 = vsub.f32 %v4430_v30, %v4457_v44  ;;  %p6944_p1 = por %p6943_p0, %p6942_p13 }
 0x45a   :  { %v7988_v19 = vsub.f32 %v4433_v32, %v4459_v3  ;;  %v7990_v6 = vpack.c.bf16 %v4463_v10, %v4459_v3  ;;  %v7992_v0 = vsub.f32 %v4435_v33, %v4463_v10  ;;  %v7994_v53 = vpack.c.bf16 %v4465_v51, %v4461_v17 }
 0x45b   :  { %v7996_v58 = vsub.f32 %v4432_v46, %v4461_v17  ;;  %v7998_v24 = vsub.f32 %v4434_v63, %v4465_v51  ;;  %v4471_v4 = vand.u32 4294901760, %v4439_v2  ;;  %v8000_v62 = vsub.f32 %v4437_v52, %v4467_v59  ;;  %p6945_p2 = pnand %p6944_p1, %p6938_p12 }
 0x45c   :  { %v4469_v29 = vand.u32 4294901760, %v4436_v12  ;;  %6483 = vmatpush1.bf16.msra.mxu0 %v7982_v57  ;;  %v4473_v55 = vand.u32 4294901760, %v4438_v8  ;;  %v4537_v9 = vand.u32 4294901760, %v7963_v41  ;;  %v4549_v16 = vand.u32 4294901760, %v7965_v31 }
 0x45d   :  { %v4441_v50 = vsel %vm81_vm0, %v4423_v7, 0  ;;  %6485 = vmatprep.subr.bf16.mxu0 %v7990_v6  ;;  %v8007_v49 = vpack.c.bf16 %v4471_v4, %v4467_v59  ;;  %v8009_v47 = vsub.f32 %v4439_v2, %v4471_v4  ;;  %v4543_v11 = vand.u32 4294901760, %v7967_v40 }
 0x45e   :  { %v8011_v13 = vsub.f32 %v4436_v12, %v4469_v29  ;;  %v8013_v36 = vand.u32 4294901760, %v4441_v50  ;;  %v8015_v45 = vpack.c.bf16 %v4473_v55, %v4469_v29  ;;  %v8017_v56 = vsub.f32 %v4438_v8, %v4473_v55 }
 0x45f   :  { %v4538_v26 = vsub.f32 %v7963_v41, %v4537_v9  ;;  %v4550_v22 = vsub.f32 %v7965_v31, %v4549_v16  ;;  %v4555_v28 = vand.u32 4294901760, %v7971_v5  ;;  %v4561_v34 = vand.u32 4294901760, %v7975_v39 }
 0x460   :  { %v8026_v25 = vsub.f32 %v4441_v50, %v8013_v36  ;;  %6487 = vmatpush1.bf16.msra.mxu0 %v7994_v53  ;;  %v4573_v37 = vand.u32 4294901760, %v7978_v23  ;;  %v4567_v15 = vand.u32 4294901760, %v7984_v61  ;;  %v4544_v35 = vsub.f32 %v7967_v40, %v4543_v11 }
 0x461   :  { %v4539_v54 = vand.u32 4294901760, %v4538_v26  ;;  %v4551_v14 = vand.u32 4294901760, %v4550_v22  ;;  %6489 = vmatprep.subr.bf16.mxu0 %v8007_v49  ;;  %v4556_v42 = vsub.f32 %v7971_v5, %v4555_v28  ;;  %v4562_v20 = vsub.f32 %v7975_v39, %v4561_v34 }
 0x462   :  { %v4526_v21 = vand.u32 4294901760, %v8026_v25  ;;  %v4574_v30 = vsub.f32 %v7978_v23, %v4573_v37  ;;  %v4568_v32 = vsub.f32 %v7984_v61, %v4567_v15  ;;  %v4579_v33 = vand.u32 4294901760, %v7986_v38 }
 0x463   :  { %v6492_v18 = vpack.c.bf16 %v4551_v14, %v4539_v54  ;;  %v4545_v63 = vand.u32 4294901760, %v4544_v35  ;;  %v4557_v52 = vand.u32 4294901760, %v4556_v42  ;;  %v4563_v1 = vand.u32 4294901760, %v4562_v20 }
 0x464   :  { %v4527_v46 = vsub.f32 %v8026_v25, %v4526_v21  ;;  %6491 = vmatpush1.bf16.msra.mxu0 %v8015_v45  ;;  %v4575_v44 = vand.u32 4294901760, %v4574_v30  ;;  %v4569_v3 = vand.u32 4294901760, %v4568_v32  ;;  %v4580_v10 = vsub.f32 %v7986_v38, %v4579_v33 }
 0x465   :  { %v4585_v17 = vand.u32 4294901760, %v7988_v19  ;;  %6493 = vmatprep.subr.bf16.mxu0 %v6492_v18  ;;  %v6494_v2 = vpack.c.bf16 %v4557_v52, %v4545_v63  ;;  %v4597_v59 = vand.u32 4294901760, %v7992_v0  ;;  %v4591_v12 = vand.u32 4294901760, %v7996_v58 }
 0x466   :  { %v4528_v51 = vand.u32 4294901760, %v4527_v46  ;;  %v6496_v8 = vpack.c.bf16 %v4575_v44, %v4563_v1  ;;  %v4581_v7 = vand.u32 4294901760, %v4580_v10  ;;  %v4603_v29 = vand.u32 4294901760, %v7998_v24 }
 0x467   :  { %v4586_v4 = vsub.f32 %v7988_v19, %v4585_v17  ;;  %v4598_v55 = vsub.f32 %v7992_v0, %v4597_v59  ;;  %v4592_v50 = vsub.f32 %v7996_v58, %v4591_v12  ;;  %v4609_v26 = vand.u32 4294901760, %v8000_v62 }
 0x468   :  { %4529 = vmatmul.mubr.f32.vlgmr.msra.gmra.mrb[24].mxu0 %v4528_v51  ;;  %v4621_v22 = vand.u32 4294901760, %v8009_v47  ;;  %v6498_v54 = vpack.c.bf16 %v4581_v7, %v4569_v3  ;;  %v4604_v35 = vsub.f32 %v7998_v24, %v4603_v29  ;;  %v4615_v42 = vand.u32 4294901760, %v8011_v13 }
 0x469   :  { %6495 = vmatpush1.bf16.msra.mxu0 %v6494_v2  ;;  %v4587_v14 = vand.u32 4294901760, %v4586_v4  ;;  %4679 = vmatprep.mubr.f32.mxu0 %v6977_v48  ;;  %v4599_v20 = vand.u32 4294901760, %v4598_v55  ;;  %v4593_v18 = vand.u32 4294901760, %v4592_v50  ;;  %v4610_v30 = vsub.f32 %v8000_v62, %v4609_v26 }
 0x46a   :  { %6497 = vmatprep.subr.bf16.mxu0 %v6496_v8  ;;  %v4622_v32 = vsub.f32 %v8009_v47, %v4621_v22  ;;  %v4605_v46 = vand.u32 4294901760, %v4604_v35  ;;  %v4616_v63 = vsub.f32 %v8011_v13, %v4615_v42  ;;  %v4627_v52 = vand.u32 4294901760, %v8017_v56 }
 0x46b   :  { %v6500_v1 = vpack.c.bf16 %v4599_v20, %v4587_v14  ;;  %v4611_v44 = vand.u32 4294901760, %v4610_v30  ;;  %v6508_v55 = vpack.c.bf16 %v7965_v31, %v7963_v41  ;;  %v6510_v50 = vpack.c.bf16 %v7971_v5, %v7967_v40 }
 0x46c   :  { %v4623_v3 = vand.u32 4294901760, %v4622_v32  ;;  %v6502_v10 = vpack.c.bf16 %v4605_v46, %v4593_v18  ;;  %v4617_v51 = vand.u32 4294901760, %v4616_v63  ;;  %v4628_v2 = vsub.f32 %v8017_v56, %v4627_v52 }
 0x46d   :  { %6499 = vmatpush1.bf16.msra.mxu0 %v6498_v54  ;;  %v6512_v54 = vpack.c.bf16 %v7978_v23, %v7975_v39  ;;  %v6514_v14 = vpack.c.bf16 %v7986_v38, %v7984_v61  ;;  %v6516_v35 = vpack.c.bf16 %v7992_v0, %v7988_v19  ;;  %v6518_v20 = vpack.c.bf16 %v7998_v24, %v7996_v58 }
 0x46e   :  { %6501 = vmatprep.subr.bf16.mxu0 %v6500_v1  ;;  %v6504_v8 = vpack.c.bf16 %v4623_v3, %v4611_v44  ;;  %v4629_v7 = vand.u32 4294901760, %v4628_v2  ;;  %v6520_v18 = vpack.c.bf16 %v8009_v47, %v8000_v62  ;;  %v6522_v30 = vpack.c.bf16 %v8017_v56, %v8011_v13 }
 0x46f   :  { %v6540_v56 = vpack.c.bf16 %v4549_v16, %v4537_v9  ;;  %v6542_v32 = vpack.c.bf16 %v4555_v28, %v4543_v11  ;;  %v6544_v46 = vpack.c.bf16 %v4573_v37, %v4561_v34  ;;  %v6546_v41 = vpack.c.bf16 %v4579_v33, %v4567_v15 }
 0x470   :  { %v6506_v4 = vpack.c.bf16 %v4629_v7, %v4617_v51  ;;  %v6548_v31 = vpack.c.bf16 %v4597_v59, %v4585_v17  ;;  %v6550_v40 = vpack.c.bf16 %v4603_v29, %v4591_v12  ;;  %v6552_v5 = vpack.c.bf16 %v4621_v22, %v4609_v26 }
 0x471   :  { %6503 = vmatpush1.bf16.msra.mxu0 %v6502_v10  ;;  %v6554_v39 = vpack.c.bf16 %v4627_v52, %v4615_v42 }
 0x472   :  { %6505 = vmatprep.subr.bf16.mxu0 %v6504_v8 }
 0x475   :  { %6507 = vmatpush1.bf16.msra.mxu0 %v6506_v4 }
 0x476   :  { %6509 = vmatprep.subr.bf16.mxu0 %v6508_v55 }
 0x478   :  { %4681 = vmatmul.mubr.f32.vlgmr.msra.gmra.mrb[24].mxu0 %v8013_v36 }
 0x479   :  { %6511 = vmatpush1.bf16.msra.mxu0 %v6510_v50  ;;  %4783 = vmatprep.mubr.f32.mxu0 %v6977_v48 }
 0x47a   :  { %6513 = vmatprep.subr.bf16.mxu0 %v6512_v54 }
 0x47d   :  { %6515 = vmatpush1.bf16.msra.mxu0 %v6514_v14 }
 0x47e   :  { %6517 = vmatprep.subr.bf16.mxu0 %v6516_v35 }
 0x481   :  { %6519 = vmatpush1.bf16.msra.mxu0 %v6518_v20 }
 0x482   :  { %6521 = vmatprep.subr.bf16.mxu0 %v6520_v18 }
 0x485   :  { %6523 = vmatpush1.bf16.msra.mxu0 %v6522_v30 }
 0x486   :  { %6525 = vmatprep.subr.bf16.mxu0 %v7961_v27 }
 0x488   :  { %4786 = vmatmul.mubr.f32.vlgmr.msra.gmra.mrb[24].mxu0 %v8026_v25 }
 0x489   :  { %6527 = vmatpush1.bf16.msra.mxu0 %v7969_v60  ;;  %4872 = vmatprep.mubr.f32.mxu0 %v6977_v48 }
 0x48a   :  { %6529 = vmatprep.subr.bf16.mxu0 %v7973_v43 }
 0x48d   :  { %6531 = vmatpush1.bf16.msra.mxu0 %v7982_v57 }
 0x48e   :  { %6533 = vmatprep.subr.bf16.mxu0 %v7990_v6 }
 0x491   :  { %6535 = vmatpush1.bf16.msra.mxu0 %v7994_v53 }
 0x492   :  { %6537 = vmatprep.subr.bf16.mxu0 %v8007_v49 }
 0x495   :  { %6539 = vmatpush1.bf16.msra.mxu0 %v8015_v45 }
 0x496   :  { %6541 = vmatprep.subr.bf16.mxu0 %v6540_v56 }
 0x498   :  { %4876 = vmatmul.mubr.f32.vlgmr.msra.gmra.mrb[24].mxu0 %v4526_v21 }
 0x499   :  { %6543 = vmatpush1.bf16.msra.mxu0 %v6542_v32  ;;  %4994 = vmatprep.mubr.f32.mxu0 %v6977_v48 }
 0x49a   :  { %6545 = vmatprep.subr.bf16.mxu0 %v6544_v46 }
 0x49d   :  { %6547 = vmatpush1.bf16.msra.mxu0 %v6546_v41 }
 0x49e   :  { %6549 = vmatprep.subr.bf16.mxu0 %v6548_v31 }
 0x4a1   :  { %6551 = vmatpush1.bf16.msra.mxu0 %v6550_v40 }
 0x4a2   :  { %6553 = vmatprep.subr.bf16.mxu0 %v6552_v5 }
 0x4a5   :  { %6555 = vmatpush1.bf16.msra.mxu0 %v6554_v39 }
 0x4a6   :  { %6557 = vmatprep.subr.bf16.mxu0 %v7961_v27  ;;  %v5148_v27 = vlaneseq }
 0x4a8   :  { %4996 = vmatmul.mubr.f32.vlgmr.msra.gmra.mrb[24].mxu0 %v8013_v36  ;;  %v8163_v23 = vshrl.u32 %v5148_v27, 7  ;;  %vm5315_vm1 = vcmp.lt.s32.totalorder %v5148_v27, 256 }
 0x4a9   :  { %6559 = vmatpush1.bf16.msra.mxu0 %v7969_v60  ;;  %5082 = vmatprep.mubr.f32.mxu0 %v6977_v48 }
 0x4aa   :  { %6561 = vmatprep.subr.bf16.mxu0 %v7973_v43  ;;  %v8166_v48 = vsub.s32 0, %v8163_v23  ;;  %v8169_v60 = vsub.s32 1, %v8163_v23  ;;  %v8171_v43 = vld [vmem:[#allocation11] sm:$0x3] }
 0x4ac   :  { %v8179_v61 = vrot.slane %v8171_v43, %v8169_v60 }
 0x4ad   :  { %6563 = vmatpush1.bf16.msra.mxu0 %v7982_v57  ;;  %v8175_v57 = vrot.slane %v8171_v43, %v8166_v48 }
 0x4ae   :  { %6565 = vmatprep.subr.bf16.mxu0 %v7990_v6  ;;  %v5160_v19 = vsel %vm5158_vm4, %v8179_v61, -inf  ;;  %v5191_v26 = vsel %vm5158_vm4, %v8179_v61, 0.0 }
 0x4af   :  { %v5159_v38 = vsel %vm5158_vm4, %v8175_v57, -inf  ;;  %v5190_v17 = vsel %vm5158_vm4, %v8175_v57, 0.0 }
 0x4b0   :  { %v5161_v6 = vmax.f32 %v5159_v38, %v5160_v19  ;;  %v5192_v1 = vadd.f32 %v5191_v26, %v5190_v17 }
 0x4b1   :  { %6567 = vmatpush1.bf16.msra.mxu0 %v7994_v53 }
 0x4b2   :  { %6569 = vmatprep.subr.bf16.mxu0 %v8007_v49  ;;  %5162 = vmax.xlane.f32.xlu0 %v5161_v6 }
 0x4b5   :  { %6571 = vmatpush1.bf16.msra.mxu0 %v8015_v45 }
 0x4b8   :  { %5084 = vmatmul.mubr.f32.vlgmr.msra.gmra.mrb[24].mxu0 %v8013_v36 }
 0x53f   :  { %v5163_v30 = vpop.xlane.xlu0 %5162 }
 0x540   :  { %v5164_v56 = vrot.slane %v5163_v30, 4 }
 0x542   :  { %v5165_v32 = vmax.f32 %v5163_v30, %v5164_v56 }
 0x544   :  { %v5166_v31 = vrot.slane %v5165_v32, 2 }
 0x546   :  { %v5167_v39 = vmax.f32 %v5165_v32, %v5166_v31 }
 0x58b   :  { %v5085_v0 = vpop.f32.mrb[24].mxu0 }
 0x58c   :  { %v5091_v53 = vsel %vm5090_vm5, %v5085_v0, 0.0  ;;  %v5087_v58 = vpop.f32.mrb[25].mxu0 }
 0x58d   :  { %v5092_v24 = vrot.slane %v5091_v53, 4  ;;  %v5098_v62 = vsel %vm5090_vm5, %v5087_v58, 0.0 }
 0x58e   :  { %v5099_v9 = vrot.slane %v5098_v62, 4 }
 0x58f   :  { %v5093_v16 = vadd.f32 %v5092_v24, %v5091_v53  ;;  %v5168_v53 = vrot.slane %v5167_v39, 1 }
 0x590   :  { %v5100_v49 = vadd.f32 %v5099_v9, %v5098_v62 }
 0x591   :  { %v5094_v47 = vrot.slane %v5093_v16, 2  ;;  %v5169_v9 = vmax.f32 %v5167_v39, %v5168_v53 }
 0x592   :  { %v5101_v13 = vrot.slane %v5100_v49, 2 }
 0x593   :  { %v5095_v36 = vadd.f32 %v5094_v47, %v5093_v16 }
 0x594   :  { %v5102_v45 = vadd.f32 %v5101_v13, %v5100_v49 }
 0x595   :  { %v5096_v25 = vrot.slane %v5095_v36, 1 }
 0x596   :  { %v5103_v11 = vrot.slane %v5102_v45, 1 }
 0x597   :  { %v5097_v28 = vadd.f32 %v5096_v25, %v5095_v36 }
 0x598   :  { %v5104_v34 = vadd.f32 %v5103_v11, %v5102_v45 }
 0x599   :  { %v8187_v37 = vmul.f32 0.33333334, %v5097_v28 }
 0x59a   :  { %v8189_v15 = vmul.f32 0.33333334, %v5104_v34 }
 0x59b   :  { %v5107_v21 = vsub.f32 %v5085_v0, %v8187_v37  ;;  %v5176_v33 = vsel %vm5158_vm4, %v8187_v37, 0.0 }
 0x59c   :  { %v5108_v59 = vsub.f32 %v5087_v58, %v8189_v15  ;;  %v5142_v12 = vmax.f32 %v8187_v37, %v8189_v15  ;;  %v5177_v29 = vsel %vm5158_vm4, %v8189_v15, 0.0  ;;  %v5259_v31 = vcombine.low %v8187_v37, %v8189_v15 }
 0x59d   :  { %v5109_v22 = vmul.f32 %v5107_v21, %v5107_v21  ;;  %v5178_v42 = vadd.f32 %v5177_v29, %v5176_v33 }
 0x59e   :  { %v5110_v63 = vmul.f32 %v5108_v59, %v5108_v59  ;;  %5143 = vmax.xlane.f32.xlu0 %v5142_v12 }
 0x59f   :  { %v5111_v52 = vsel %vm5090_vm5, %v5109_v22, 0.0  ;;  %5179 = vadd.xlane.f32.xlu1 %v5178_v42 }
 0x5a0   :  { %v5118_v44 = vsel %vm5090_vm5, %v5110_v63, 0.0  ;;  %v5112_v3 = vrot.slane %v5111_v52, 4 }
 0x5a1   :  { %v5119_v10 = vrot.slane %v5118_v44, 4 }
 0x5a2   :  { %v5113_v51 = vadd.f32 %v5112_v3, %v5111_v52 }
 0x5a3   :  { %5193 = vadd.xlane.f32.xlu1 %v5192_v1  ;;  %v5120_v2 = vadd.f32 %v5119_v10, %v5118_v44 }
 0x5a4   :  { %v5114_v8 = vrot.slane %v5113_v51, 2 }
 0x5a5   :  { %v5121_v7 = vrot.slane %v5120_v2, 2 }
 0x5a6   :  { %v5115_v4 = vadd.f32 %v5114_v8, %v5113_v51 }
 0x5a7   :  { %v5122_v55 = vadd.f32 %v5121_v7, %v5120_v2 }
 0x5a8   :  { %v5116_v50 = vrot.slane %v5115_v4, 1 }
 0x5a9   :  { %v5123_v54 = vrot.slane %v5122_v55, 1 }
 0x5aa   :  { %v5117_v14 = vadd.f32 %v5116_v50, %v5115_v4 }
 0x5ab   :  { %v5124_v35 = vadd.f32 %v5123_v54, %v5122_v55 }
 0x5ac   :  { %v5125_v20 = vmul.f32 0.5, %v5117_v14 }
 0x5ad   :  { %v5126_v18 = vmul.f32 0.5, %v5124_v35  ;;  %v6979_v35 = vmov 1966171168  }
 0x5ae   :  { %6815 = vrsqrt.f32 %v5125_v20  ;;  %vm5129_vm6 = vcmp.eq.f32.partialorder %v5125_v20, inf  ;;  %v5132_v19 = vand.u32 2147483648, %v5125_v20  ;;  %vm5131_vm8 = vcmp.eq.f32.partialorder %v5125_v20, 0.0 }
 0x5af   :  { %6817 = vrsqrt.f32 %v5126_v18  ;;  %vm5136_vm7 = vcmp.eq.f32.partialorder %v5126_v18, inf  ;;  %v5139_v0 = vand.u32 2147483648, %v5126_v18  ;;  %vm5138_vm9 = vcmp.eq.f32.partialorder %v5126_v18, 0.0 }
 0x5b8   :  { %v6816_v46 = vpop.eup %6815 }
 0x5b9   :  { %v6818_v41 = vpop.eup %6817  ;;  %v5128_v40 = vmul.f32 %v6816_v46, %v5125_v20 }
 0x5ba   :  { %v5135_v5 = vmul.f32 %v6818_v41, %v5126_v18 }
 0x5bb   :  { %v5130_v38 = vsel %vm5129_vm6, %v5125_v20, %v5128_v40  ;;  %v5261_v20 = vunpack.c.l.s4 %v6979_v35 }
 0x5bc   :  { %v5137_v6 = vsel %vm5136_vm7, %v5126_v18, %v5135_v5  ;;  %v5133_v58 = vsel %vm5131_vm8, %v5132_v19, %v5130_v38 }
 0x5bd   :  { %v5140_v24 = vsel %vm5138_vm9, %v5139_v0, %v5137_v6  ;;  %v5220_v16 = vmax.f32 %v5133_v58, 0.05  ;;  %v5262_v32 = vunpack.c.0.s8 %v5261_v20 }
 0x5be   :  { %v5221_v47 = vmax.f32 %v5140_v24, 0.05 }
 0x5bf   :  { %v5222_v45 = vmul.f32 %v5220_v16, %v5220_v16  ;;  %v5265_v40 = vsub.s32 %v5262_v32, %v8163_v23 }
 0x5c0   :  { %v5223_v11 = vmul.f32 %v5221_v47, %v5221_v47 }
 0x5c1   :  { %6819 = vrcp.f32 %v5222_v45  ;;  %v5266_v19 = vrot.slane %v5259_v31, %v5265_v40 }
 0x5c2   :  { %6821 = vrcp.f32 %v5223_v11 }
 0x5cb   :  { %v6820_v42 = vpop.eup %6819 }
 0x5cc   :  { %v6822_v63 = vpop.eup %6821  ;;  %v5226_v52 = vmul.f32 %v6820_v42, %v5222_v45 }
 0x5cd   :  { %v5227_v1 = vmul.f32 %v6822_v63, %v5223_v11 }
 0x5ce   :  { %v5228_v44 = vsub.f32 2.0, %v5226_v52 }
 0x5cf   :  { %v5229_v3 = vsub.f32 2.0, %v5227_v1 }
 0x5d0   :  { %v5230_v10 = vmul.f32 %v6820_v42, %v5228_v44 }
 0x5d1   :  { %v5231_v51 = vmul.f32 %v6822_v63, %v5229_v3 }
 0x5d2   :  { %v5232_v2 = vmul.f32 0.0001, %v5230_v10 }
 0x5d3   :  { %v5233_v8 = vmul.f32 0.0001, %v5231_v51 }
 0x5d4   :  { %v5234_v7 = vsub.f32 1.0, %v5232_v2 }
 0x5d5   :  { %v5235_v4 = vsub.f32 1.0, %v5233_v8 }
 0x5d6   :  { %v5236_v55 = vmul.f32 %v5234_v7, %v5234_v7 }
 0x5d7   :  { %v5237_v50 = vmul.f32 %v5235_v4, %v5235_v4 }
 0x5d8   :  { %v5238_v54 = vmul.f32 %v5236_v55, %v5236_v55 }
 0x5d9   :  { %v5239_v14 = vmul.f32 %v5237_v50, %v5237_v50 }
 0x5da   :  { %v5242_v18 = vmul.f32 %v5238_v54, %v5238_v54  ;;  %v5240_v24 = vmul.f32 %v5238_v54, %v5236_v55 }
 0x5db   :  { %v5243_v30 = vmul.f32 %v5239_v14, %v5239_v14 }
 0x5dc   :  { %v5244_v46 = vmul.f32 %v5242_v18, %v5242_v18 }
 0x5dd   :  { %v5245_v41 = vmul.f32 %v5243_v30, %v5243_v30 }
 0x5de   :  { %v5248_v39 = vmul.f32 %v5244_v46, %v5244_v46 }
 0x5df   :  { %v5249_v38 = vmul.f32 %v5245_v41, %v5245_v41 }
 0x5e0   :  { %v5250_v6 = vmul.f32 %v5248_v39, %v5248_v39 }
 0x5e1   :  { %v5251_v0 = vmul.f32 %v5249_v38, %v5249_v38 }
 0x5e2   :  { %v5252_v16 = vmul.f32 %v5250_v6, %v5250_v6 }
 0x62b   :  { %v5144_v62 = vpop.xlane.xlu0 %5143 }
 0x62c   :  { %v5180_v49 = vpop.xlane.xlu1 %5179  ;;  %6732 = vpush %v5144_v62  ;;  %v5273_v62 = vrot.slane %v5266_v19, %v5265_v40 }
 0x62d   :  { %v5181_v13 = vrot.slane %v5180_v49, 4  ;;  %6734 = vpush %v5169_v9  ;;  %v5241_v9 = vmul.f32 %v5239_v14, %v5237_v50 }
 0x62f   :  { %v5182_v36 = vadd.f32 %v5181_v13, %v5180_v49  ;;  %v5253_v49 = vmul.f32 %v5251_v0, %v5251_v0  ;;  %v5246_v13 = vmul.f32 %v5244_v46, %v5240_v24  ;;  %v5247_v23 = vmul.f32 %v5245_v41, %v5241_v9 }
 0x630   :  { %v5194_v25 = vpop.xlane.xlu1 %5193 }
 0x631   :  { %v5183_v28 = vrot.slane %v5182_v36, 2  ;;  %v5195_v34 = vrot.slane %v5194_v25, 4 }
 0x633   :  { %v5196_v21 = vadd.f32 %v5195_v34, %v5194_v25  ;;  %v5184_v33 = vadd.f32 %v5183_v28, %v5182_v36  ;;  %v5254_v28 = vmul.f32 %v5252_v16, %v5246_v13  ;;  %v5255_v34 = vmul.f32 %v5253_v49, %v5247_v23 }
 0x635   :  { %v5197_v17 = vrot.slane %v5196_v21, 2  ;;  %v5185_v59 = vrot.slane %v5184_v33, 1 }
 0x637   :  { %v5198_v12 = vadd.f32 %v5197_v17, %v5196_v21  ;;  %v5186_v29 = vadd.f32 %v5185_v59, %v5184_v33 }
 0x639   :  { %6736 = vpush %v5186_v29  ;;  %v5199_v26 = vrot.slane %v5198_v12, 1 }
 0x63b   :  { %v5200_v22 = vadd.f32 %v5199_v26, %v5198_v12  ;;  %v6980_v26 = vmov 0  }
 0x63d   :  { %6738 = vpush %v5200_v22 }
 0x65d   :  { %s6733_s4 = spop %6732 }
 0x65e   :  { %s8205_s25 = spop %6734  ;;  %v5146_v5 = vstv %s6733_s4 }
 0x65f   :  { %v5171_v56 = vstv %s8205_s25 }
 0x660   :  { %6823 = vrcp.f32 %v5171_v56 }
 0x661   :  { %6825 = vrcp.f32 %v5146_v5 }
 0x66a   :  { %v6824_v53 = vpop.eup %6823  ;;  %s6737_s26 = spop %6736 }
 0x66b   :  { %v5173_v58 = vmul.f32 %v6824_v53, %v5146_v5  ;;  %v5188_v45 = vstv %s6737_s26  ;;  %v6826_v17 = vpop.eup %6825 }
 0x66c   :  { %v5189_v59 = vmul.f32 0.00390625, %v5188_v45  ;;  %v5175_v52 = vmul.f32 %v6826_v17, %v5171_v56 }
 0x66d   :  { %v5256_v47 = vmul.f32 %v5173_v58, %v8171_v43 }
 0x66e   :  { %s6739_s27 = spop %6738  ;;  %vm5204_vm11 = vcmp.gt.f32.partialorder %v8187_v37, %v5189_v59  ;;  %vm5205_vm14 = vcmp.gt.f32.partialorder %v8189_v15, %v5189_v59 }
 0x66f   :  { %v5275_v36 = vsub.f32 %v5256_v47, %v5273_v62  ;;  %v5202_v25 = vstv %s6739_s27 }
 0x670   :  { %v5203_v11 = vmul.f32 0.00390625, %v5202_v25 }
 0x671   :  { %v5280_v21 = vrot.slane %v5275_v36, %v8166_v48  ;;  %v5284_v33 = vrot.slane %v5275_v36, %v8169_v60 }
 0x672   :  { %vm5206_vm10 = vcmp.gt.f32.partialorder %v8171_v43, %v5203_v11 }
 0x673   :  { %v5287_v12 = vmul.f32 %v5280_v21, %v5254_v28  ;;  %v5288_v29 = vmul.f32 %v5284_v33, %v5255_v34  ;;  %v5207_v22 = vsel %vm5206_vm10, 1, %v6980_v26 }
 0x674   :  { %v5211_v42 = vrot.slane %v5207_v22, %v8166_v48  ;;  %v5215_v63 = vrot.slane %v5207_v22, %v8169_v60 }
 0x675   :  { %v5289_v1 = vadd.f32 %v5287_v12, %v8187_v37  ;;  %v5290_v44 = vadd.f32 %v5288_v29, %v8189_v15 }
 0x676   :  { %vm5216_vm12 = vcmp.ne.s32.totalorder %v5211_v42, 0  ;;  %vm5217_vm13 = vcmp.ne.s32.totalorder %v5215_v63, 0 }
 0x677   :  { %v5291_v3 = vmul.f32 %v5289_v1, %v5175_v52  ;;  %v5292_v10 = vmul.f32 %v5290_v44, %v5175_v52  ;;  %vm5218_vm15 = vmand %vm5204_vm11, %vm5216_vm12 }
 0x678   :  { %vm5219_vm0 = vmand %vm5205_vm14, %vm5217_vm13 }
 0x679   :  { %v5293_v43 = vsel %vm5218_vm15, %v5291_v3, %v8175_v57  ;;  %v5294_v48 = vsel %vm5219_vm0, %v5292_v10, %v8179_v61 }
 0x67a   :  { %v5297_v60 = vcombine.low %v5293_v43, %v5294_v48 }
 0x67c   :  { %v5304_v51 = vrot.slane %v5297_v60, %v5265_v40 }
 0x67e   :  { %v5311_v2 = vrot.slane %v5304_v51, %v5265_v40 }
 0x680   :  { %5317 = vst.msk [vmem:[#allocation13] sm:$0x3] %vm5315_vm1, %v5311_v2 }
 0x681   :  { %6948 = shalt.err (!%p6945_p2)
}
 0x682   :  { %s6949_s7 = scalar_lea.hbm %s8241_s5, 32 }
 0x683   :  { %p6950_p3 = scmp.ne.s32.totalorder %s8241_s5, %s6949_s7  ;;  %p6953_p4 = scmp.lt.u32.totalorder %s6949_s7, %s8241_s5 }
 0x685   :  { %p6955_p5 = pnand %p6953_p4, %p6950_p3 }
 0x687   :  { %6958 = shalt.err (!%p6955_p5)
}
 0x688   :  { %5327 = dma.vmem_to_hbm [thread:$0]  %s5325_s28, 32, %s8241_s5, [#allocation7]  }
 0x689   :  { %6967 = dma.done.wait [#allocation7], 32  }
 0x68a   :  { %6968 = vsyncadd [#allocation7], 4294967264 }
 0x68b   :  { %5331 = vsyncpa [#allocation6], 1 }
 0x68c   :  { %5332 = vsyncpa [#allocation9], 1 }
 0x68d   :  { %5333 = vsyncpa [#allocation12], 1 }
 0x68e   :  { %5334 = vsyncpa [#allocation7], 1 }
 0x68f   :  { %5335 = vsyncmov [#allocation4] }
 0x692   :  { %s5336_s2 = vpop.sfrf %5335 }
 0x693   :  { %p5341_p6 = scmp.ne.s32.totalorder %s5336_s2, 0 }
 0x695   :  { %5340 = shalt.err (%p5341_p6)  }

</bundles_post_ra>
